<compile_context>
chip_gen: v7x
topology: tpu7x:2x2x1
jax: 0.10.0
libtpu: 0.0.40
codegen_flags: <defaults>
</compile_context>

<pallas_src>
import functools

import numpy as np
import jax
import jax.numpy as jnp
from jax.experimental import pallas as pl
from jax.experimental.pallas import tpu as pltpu


def _round_up(v, m):
    return ((v + m - 1) // m) * m


def _pad2(a, rows, cols):
    a = jnp.asarray(a, jnp.float32)
    return jnp.pad(a, ((0, rows - a.shape[0]), (0, cols - a.shape[1])))


def _vmem():
    return pl.BlockSpec(memory_space=pltpu.MemorySpace.VMEM)


# --------------------------------------------------------------------------
# Fused kernel: (EdgeConv + BN (+ReLU)) x3  +  mean-pool + Linear + softmax
# --------------------------------------------------------------------------
def fused_graph_kernel(
    slots_ref, batch_ref, x_ref,
    w1_ref, b1_ref, g1_ref, be1_ref,
    w2_ref, b2_ref, g2_ref, be2_ref,
    w3_ref, b3_ref, g3_ref, be3_ref,
    wl_ref, bl_ref,
    out_ref,
    *, num_nodes, num_classes, max_deg, eps=1e-5,
):
    n_pad = x_ref.shape[0]
    g_pad, c_pad = out_ref.shape
    h_pad = wl_ref.shape[0]

    # Row-validity mask for real nodes (padded rows contribute nothing).
    row_id = jax.lax.broadcasted_iota(jnp.int32, (n_pad, 1), 0)
    node_mask = (row_id < num_nodes).astype(jnp.float32)          # [N_pad, 1]
    inv_n = 1.0 / float(num_nodes)

    # ---- slot-derived structures: built ONCE, reused by all 3 layers -------
    node_lane = jax.lax.broadcasted_iota(jnp.int32, (n_pad, n_pad), 1)
    slots = slots_ref[...]                                        # [N_pad, K] int32
    sels, valids = [], []
    for k in range(max_deg):   # static unroll OK for small max_deg
        ids = slots[:, k:k + 1]                                   # [N_pad, 1] (-1 = pad)
        sels.append((ids == node_lane).astype(jnp.bfloat16))      # exact one-hot
        valids.append(ids >= 0)

    def edge_conv_bn(x, w_ref, bias_ref, gamma_ref, beta_ref, relu_after):
        # EdgeConv message: relu([x_i || x_j - x_i] @ W + b)
        #   = relu(x_i @ (Wa - Wb) + x_j @ Wb + b) = relu(u_i + v_j + b)
        # Single fused MXU matmul: uv = x @ [Wt | Ws] (bf16 operands, f32 acc).
        uv = jnp.dot(x.astype(jnp.bfloat16), w_ref[...],
                     preferred_element_type=jnp.float32)          # [N_pad, 2*H_pad]
        u, v = uv[:, :h_pad], uv[:, h_pad:]
        ub = u + bias_ref[...]                                    # hoisted out of k-loop
        v16 = v.astype(jnp.bfloat16)
        agg = jnp.zeros_like(u)   # 0-fill: nodes with no in-edges stay 0 (relu msgs >= 0)
        for k in range(max_deg):
            v_src = jnp.dot(sels[k], v16, preferred_element_type=jnp.float32)
            msg = jnp.maximum(ub + v_src, 0.0)
            agg = jnp.maximum(agg, jnp.where(valids[k], msg, 0.0))
        # BatchNorm1d (training mode: batch statistics over the real nodes,
        # biased variance).  Padded rows of agg are already exactly 0.
        mean = jnp.sum(agg, axis=0, keepdims=True) * inv_n
        cen = (agg - mean) * node_mask
        var = jnp.sum(cen * cen, axis=0, keepdims=True) * inv_n
        scale = gamma_ref[...] * jax.lax.rsqrt(var + eps)         # folded BN scale
        y = cen * scale + beta_ref[...]
        if relu_after:
            y = jnp.maximum(y, 0.0)
        return y * node_mask                                      # keep padded rows at 0

    h = edge_conv_bn(x_ref[...], w1_ref, b1_ref, g1_ref, be1_ref, True)
    h = edge_conv_bn(h, w2_ref, b2_ref, g2_ref, be2_ref, True)
    h = edge_conv_bn(h, w3_ref, b3_ref, g3_ref, be3_ref, False)

    # global_mean_pool: exact bf16 one-hot sum on the MXU, f32 divide by counts.
    bidx = batch_ref[...]                                          # [1, N_pad] (-1 = pad)
    graph_row = jax.lax.broadcasted_iota(jnp.int32, (g_pad, n_pad), 0)
    onehot = (bidx == graph_row)                                   # [G_pad, N_pad]
    counts = jnp.sum(onehot.astype(jnp.float32), axis=1, keepdims=True)
    summed = jnp.dot(onehot.astype(jnp.bfloat16), h.astype(jnp.bfloat16),
                     preferred_element_type=jnp.float32)           # [G_pad, H_pad]
    pooled = summed / jnp.maximum(counts, 1.0)

    # Linear head + exact softmax over the first num_classes lanes.
    logits = jnp.dot(pooled.astype(jnp.bfloat16), wl_ref[...],
                     preferred_element_type=jnp.float32) + bl_ref[...]
    lane_c = jax.lax.broadcasted_iota(jnp.int32, (g_pad, c_pad), 1)
    logits = jnp.where(lane_c < num_classes, logits, -1e30)        # f32 path: safe
    m = jnp.max(logits, axis=1, keepdims=True)
    e = jnp.exp(logits - m)
    denom = jnp.sum(e, axis=1, keepdims=True)
    out_ref[...] = e / denom                                       # exact row-sum = 1


# --------------------------------------------------------------------------
# Host-side glue: graph structure -> incoming-neighbor slot table
# --------------------------------------------------------------------------
def _build_slot_table(edge_index, num_nodes, n_pad):
    src = np.asarray(edge_index[0], dtype=np.int64)
    tgt = np.asarray(edge_index[1], dtype=np.int64)
    deg = np.zeros(num_nodes, dtype=np.int64)
    if tgt.size:
        np.add.at(deg, tgt, 1)
    max_deg = max(int(deg.max()) if deg.size else 1, 1)
    k_pad = max(_round_up(max_deg, 8), 8)            # NOT 128-lane padded anymore
    table = np.full((n_pad, k_pad), -1, dtype=np.int32)
    fill = np.zeros(num_nodes, dtype=np.int64)
    for e in range(src.shape[0]):
        t = int(tgt[e])
        table[t, fill[t]] = int(src[e])
        fill[t] += 1
    return jnp.asarray(table), max_deg


# --------------------------------------------------------------------------
# Full forward pass
# --------------------------------------------------------------------------
def graph_network_forward(params, x, edge_index, batch, num_graphs):
    n, d = x.shape
    hidden = params["w1"].shape[1]
    num_classes = params["wl"].shape[1]

    n_pad = _round_up(n, 8)
    d_pad = _round_up(d, 128)
    h_pad = _round_up(hidden, 128)
    c_pad = _round_up(num_classes, 128)
    g_pad = _round_up(num_graphs, 8)

    slots, max_deg = _build_slot_table(edge_index, n, n_pad)

    batch_np = np.full((1, n_pad), -1, dtype=np.int32)
    batch_np[0, :n] = np.asarray(batch, dtype=np.int32)
    batch_row = jnp.asarray(batch_np)

    x_p = _pad2(x, n_pad, d_pad)

    def conv_weights(w, b, din, din_pad):
        wa, wb = w[:din, :], w[din:, :]
        wt = _pad2(wa - wb, din_pad, h_pad)            # target-side weight
        ws = _pad2(wb, din_pad, h_pad)                 # source-side weight
        wcat = jnp.concatenate([wt, ws], axis=1).astype(jnp.bfloat16)  # [din_pad, 2H_pad]
        return wcat, _pad2(b.reshape(1, -1), 1, h_pad)

    w1, bias1 = conv_weights(params["w1"], params["b1"], d, d_pad)
    w2, bias2 = conv_weights(params["w2"], params["b2"], hidden, h_pad)
    w3, bias3 = conv_weights(params["w3"], params["b3"], hidden, h_pad)

    def bn_params(g, b):
        return _pad2(g.reshape(1, -1), 1, h_pad), _pad2(b.reshape(1, -1), 1, h_pad)

    g1, be1 = bn_params(params["bn1_g"], params["bn1_b"])
    g2, be2 = bn_params(params["bn2_g"], params["bn2_b"])
    g3, be3 = bn_params(params["bn3_g"], params["bn3_b"])

    wl = _pad2(params["wl"], h_pad, c_pad).astype(jnp.bfloat16)
    bl = _pad2(params["bl"].reshape(1, -1), 1, c_pad)

    kernel = functools.partial(
        fused_graph_kernel,
        num_nodes=n, num_classes=num_classes, max_deg=max_deg,
    )
    out = pl.pallas_call(
        kernel,
        out_shape=jax.ShapeDtypeStruct((g_pad, c_pad), jnp.float32),
        in_specs=[_vmem()] * 17,
        out_specs=_vmem(),
    )(slots, batch_row, x_p,
      w1, bias1, g1, be1,
      w2, bias2, g2, be2,
      w3, bias3, g3, be3,
      wl, bl)
    return out[:num_graphs, :num_classes]


def init_params(key, input_dim, hidden, num_classes):
    ks = jax.random.split(key, 8)
    return {
        "w1": 0.1 * jax.random.normal(ks[0], (2 * input_dim, hidden), jnp.float32),
        "b1": 0.1 * jax.random.normal(ks[1], (hidden,), jnp.float32),
        "w2": 0.1 * jax.random.normal(ks[2], (2 * hidden, hidden), jnp.float32),
        "b2": 0.1 * jax.random.normal(ks[3], (hidden,), jnp.float32),
        "w3": 0.1 * jax.random.normal(ks[4], (2 * hidden, hidden), jnp.float32),
        "b3": 0.1 * jax.random.normal(ks[5], (hidden,), jnp.float32),
        "bn1_g": jnp.ones((hidden,), jnp.float32),
        "bn1_b": jnp.zeros((hidden,), jnp.float32),
        "bn2_g": jnp.ones((hidden,), jnp.float32),
        "bn2_b": jnp.zeros((hidden,), jnp.float32),
        "bn3_g": jnp.ones((hidden,), jnp.float32),
        "bn3_b": jnp.zeros((hidden,), jnp.float32),
        "wl": 0.1 * jax.random.normal(ks[6], (hidden, num_classes), jnp.float32),
        "bl": 0.1 * jax.random.normal(ks[7], (num_classes,), jnp.float32),
    }


if __name__ == "__main__":
    hidden_channels = 32
    input_dim = 8
    num_classes = 2

    num_graphs = 2
    nodes_per_graph = 8
    num_nodes = num_graphs * nodes_per_graph

    key = jax.random.PRNGKey(0)
    k_x, k_p = jax.random.split(key)

    # Node features [N, D]
    x = jax.random.normal(k_x, (num_nodes, input_dim), jnp.float32)

    # Bidirectional ring within each graph -> every node has incoming edges.
    src_list, tgt_list = [], []
    for g in range(num_graphs):
        off = g * nodes_per_graph
        for i in range(nodes_per_graph):
            a = off + i
            b = off + (i + 1) % nodes_per_graph
            src_list += [a, b]
            tgt_list += [b, a]
    edge_index = jnp.array([src_list, tgt_list], dtype=jnp.int32)  # [2, E]

    # Graph assignment per node.
    batch = jnp.repeat(jnp.arange(num_graphs, dtype=jnp.int32), nodes_per_graph)

    params = init_params(k_p, input_dim, hidden_channels, num_classes)

    out = graph_network_forward(params, x, edge_index, batch, num_graphs)
    out = jax.block_until_ready(out)

    assert out.shape == (num_graphs, num_classes)
    assert bool(jnp.all(jnp.isfinite(out)))
    assert bool(jnp.all(out >= 0.0))
    # each row is a probability distribution (exact softmax normalization)
    assert bool(jnp.all(jnp.abs(jnp.sum(out, axis=1) - 1.0) < 1e-3))
    print("KERNEL_OK")
</pallas_src>

<mosaic_0001>
module attributes {stable_mosaic.version = 11 : i64} {
  func.func @fused_graph_kernel(%arg0: memref<16x8xi32, #tpu.memory_space<vmem>>, %arg1: memref<1x16xi32, #tpu.memory_space<vmem>>, %arg2: memref<16x128xf32, #tpu.memory_space<vmem>>, %arg3: memref<128x256xbf16, #tpu.memory_space<vmem>>, %arg4: memref<1x128xf32, #tpu.memory_space<vmem>>, %arg5: memref<1x128xf32, #tpu.memory_space<vmem>>, %arg6: memref<1x128xf32, #tpu.memory_space<vmem>>, %arg7: memref<128x256xbf16, #tpu.memory_space<vmem>>, %arg8: memref<1x128xf32, #tpu.memory_space<vmem>>, %arg9: memref<1x128xf32, #tpu.memory_space<vmem>>, %arg10: memref<1x128xf32, #tpu.memory_space<vmem>>, %arg11: memref<128x256xbf16, #tpu.memory_space<vmem>>, %arg12: memref<1x128xf32, #tpu.memory_space<vmem>>, %arg13: memref<1x128xf32, #tpu.memory_space<vmem>>, %arg14: memref<1x128xf32, #tpu.memory_space<vmem>>, %arg15: memref<128x128xbf16, #tpu.memory_space<vmem>>, %arg16: memref<1x128xf32, #tpu.memory_space<vmem>>, %arg17: memref<8x128xf32, #tpu.memory_space<vmem>>) attributes {dimension_semantics = [], scalar_prefetch = 0 : i64, scratch_operands = 0 : i64, tpu.core_type = #tpu.core_type<tc>} {
    %0 = tpu.iota {dimensions = array<i32: 0>} : vector<16x1xi32>
    %c16_i32 = arith.constant 16 : i32
    %1 = vector.broadcast %c16_i32 : i32 to vector<16x1xi32>
    %2 = arith.cmpi slt, %0, %1 : vector<16x1xi32>
    %3 = arith.extui %2 : vector<16x1xi1> to vector<16x1xi32>
    %4 = arith.sitofp %3 : vector<16x1xi32> to vector<16x1xf32>
    %5 = tpu.iota {dimensions = array<i32: 1>} : vector<16x16xi32>
    %c0 = arith.constant 0 : index
    %c0_0 = arith.constant 0 : index
    %6 = vector.load %arg0[%c0, %c0_0] : memref<16x8xi32, #tpu.memory_space<vmem>>, vector<16x8xi32>
    %7 = vector.extract_strided_slice %6 {offsets = [0, 0], sizes = [16, 1], strides = [1, 1]} : vector<16x8xi32> to vector<16x1xi32>
    %8 = vector.broadcast %7 : vector<16x1xi32> to vector<16x16xi32>
    %9 = arith.cmpi eq, %8, %5 : vector<16x16xi32>
    %10 = arith.extui %9 : vector<16x16xi1> to vector<16x16xi32>
    %11 = arith.sitofp %10 : vector<16x16xi32> to vector<16x16xf32>
    %12 = arith.truncf %11 : vector<16x16xf32> to vector<16x16xbf16>
    %c0_i32 = arith.constant 0 : i32
    %13 = vector.broadcast %c0_i32 : i32 to vector<16x1xi32>
    %14 = arith.cmpi sge, %7, %13 : vector<16x1xi32>
    %15 = vector.extract_strided_slice %6 {offsets = [0, 1], sizes = [16, 1], strides = [1, 1]} : vector<16x8xi32> to vector<16x1xi32>
    %16 = vector.broadcast %15 : vector<16x1xi32> to vector<16x16xi32>
    %17 = arith.cmpi eq, %16, %5 : vector<16x16xi32>
    %18 = arith.extui %17 : vector<16x16xi1> to vector<16x16xi32>
    %19 = arith.sitofp %18 : vector<16x16xi32> to vector<16x16xf32>
    %20 = arith.truncf %19 : vector<16x16xf32> to vector<16x16xbf16>
    %c0_i32_1 = arith.constant 0 : i32
    %21 = vector.broadcast %c0_i32_1 : i32 to vector<16x1xi32>
    %22 = arith.cmpi sge, %15, %21 : vector<16x1xi32>
    %c0_2 = arith.constant 0 : index
    %c0_3 = arith.constant 0 : index
    %23 = vector.load %arg2[%c0_2, %c0_3] : memref<16x128xf32, #tpu.memory_space<vmem>>, vector<16x128xf32>
    %24 = arith.truncf %23 : vector<16x128xf32> to vector<16x128xbf16>
    %c0_4 = arith.constant 0 : index
    %c0_5 = arith.constant 0 : index
    %25 = vector.load %arg3[%c0_4, %c0_5] : memref<128x256xbf16, #tpu.memory_space<vmem>>, vector<128x256xbf16>
    %cst = arith.constant dense<0.000000e+00> : vector<16x256xf32>
    %26 = tpu.matmul %24, %25, %cst {dimension_numbers = #tpu.dot_dimension_numbers<[1], [0], [0], [1], [0, 0, 1, 1], [], []>} : vector<16x128xbf16>, vector<128x256xbf16>, vector<16x256xf32> -> vector<16x256xf32>
    %27 = vector.extract_strided_slice %26 {offsets = [0, 0], sizes = [16, 128], strides = [1, 1]} : vector<16x256xf32> to vector<16x128xf32>
    %28 = vector.extract_strided_slice %26 {offsets = [0, 128], sizes = [16, 128], strides = [1, 1]} : vector<16x256xf32> to vector<16x128xf32>
    %c0_6 = arith.constant 0 : index
    %c0_7 = arith.constant 0 : index
    %29 = vector.load %arg4[%c0_6, %c0_7] : memref<1x128xf32, #tpu.memory_space<vmem>>, vector<1x128xf32>
    %30 = vector.broadcast %29 : vector<1x128xf32> to vector<16x128xf32>
    %31 = arith.addf %27, %30 : vector<16x128xf32>
    %32 = arith.truncf %28 : vector<16x128xf32> to vector<16x128xbf16>
    %cst_8 = arith.constant 0.000000e+00 : f32
    %33 = vector.broadcast %cst_8 : f32 to vector<16x128xf32>
    %cst_9 = arith.constant dense<0.000000e+00> : vector<16x128xf32>
    %34 = tpu.matmul %12, %32, %cst_9 {dimension_numbers = #tpu.dot_dimension_numbers<[1], [0], [0], [1], [0, 0, 1, 1], [], []>} : vector<16x16xbf16>, vector<16x128xbf16>, vector<16x128xf32> -> vector<16x128xf32>
    %35 = arith.addf %31, %34 : vector<16x128xf32>
    %cst_10 = arith.constant 0.000000e+00 : f32
    %36 = vector.broadcast %cst_10 : f32 to vector<16x128xf32>
    %37 = arith.maximumf %35, %36 : vector<16x128xf32>
    %cst_11 = arith.constant 0.000000e+00 : f32
    %38 = vector.shape_cast %14 : vector<16x1xi1> to vector<16x1xi1>
    %39 = vector.broadcast %38 : vector<16x1xi1> to vector<16x128xi1>
    %40 = vector.broadcast %cst_11 : f32 to vector<16x128xf32>
    %41 = arith.select %39, %37, %40 : vector<16x128xi1>, vector<16x128xf32>
    %42 = arith.maximumf %33, %41 : vector<16x128xf32>
    %cst_12 = arith.constant dense<0.000000e+00> : vector<16x128xf32>
    %43 = tpu.matmul %20, %32, %cst_12 {dimension_numbers = #tpu.dot_dimension_numbers<[1], [0], [0], [1], [0, 0, 1, 1], [], []>} : vector<16x16xbf16>, vector<16x128xbf16>, vector<16x128xf32> -> vector<16x128xf32>
    %44 = arith.addf %31, %43 : vector<16x128xf32>
    %cst_13 = arith.constant 0.000000e+00 : f32
    %45 = vector.broadcast %cst_13 : f32 to vector<16x128xf32>
    %46 = arith.maximumf %44, %45 : vector<16x128xf32>
    %cst_14 = arith.constant 0.000000e+00 : f32
    %47 = vector.shape_cast %22 : vector<16x1xi1> to vector<16x1xi1>
    %48 = vector.broadcast %47 : vector<16x1xi1> to vector<16x128xi1>
    %49 = vector.broadcast %cst_14 : f32 to vector<16x128xf32>
    %50 = arith.select %48, %46, %49 : vector<16x128xi1>, vector<16x128xf32>
    %51 = arith.maximumf %42, %50 : vector<16x128xf32>
    %cst_15 = arith.constant dense<0.000000e+00> : vector<128xf32>
    %52 = vector.multi_reduction <add>, %51, %cst_15 [0] : vector<16x128xf32> to vector<128xf32>
    %53 = vector.shape_cast %52 : vector<128xf32> to vector<1x128xf32>
    %cst_16 = arith.constant 6.250000e-02 : f32
    %54 = vector.broadcast %cst_16 : f32 to vector<1x128xf32>
    %55 = arith.mulf %53, %54 : vector<1x128xf32>
    %56 = vector.broadcast %55 : vector<1x128xf32> to vector<16x128xf32>
    %57 = arith.subf %51, %56 : vector<16x128xf32>
    %58 = vector.broadcast %4 : vector<16x1xf32> to vector<16x128xf32>
    %59 = arith.mulf %57, %58 : vector<16x128xf32>
    %60 = arith.mulf %59, %59 : vector<16x128xf32>
    %cst_17 = arith.constant dense<0.000000e+00> : vector<128xf32>
    %61 = vector.multi_reduction <add>, %60, %cst_17 [0] : vector<16x128xf32> to vector<128xf32>
    %62 = vector.shape_cast %61 : vector<128xf32> to vector<1x128xf32>
    %cst_18 = arith.constant 6.250000e-02 : f32
    %63 = vector.broadcast %cst_18 : f32 to vector<1x128xf32>
    %64 = arith.mulf %62, %63 : vector<1x128xf32>
    %c0_19 = arith.constant 0 : index
    %c0_20 = arith.constant 0 : index
    %65 = vector.load %arg5[%c0_19, %c0_20] : memref<1x128xf32, #tpu.memory_space<vmem>>, vector<1x128xf32>
    %cst_21 = arith.constant 9.99999974E-6 : f32
    %66 = vector.broadcast %cst_21 : f32 to vector<1x128xf32>
    %67 = arith.addf %64, %66 : vector<1x128xf32>
    %68 = math.rsqrt %67 : vector<1x128xf32>
    %69 = arith.mulf %65, %68 : vector<1x128xf32>
    %70 = vector.broadcast %69 : vector<1x128xf32> to vector<16x128xf32>
    %71 = arith.mulf %59, %70 : vector<16x128xf32>
    %c0_22 = arith.constant 0 : index
    %c0_23 = arith.constant 0 : index
    %72 = vector.load %arg6[%c0_22, %c0_23] : memref<1x128xf32, #tpu.memory_space<vmem>>, vector<1x128xf32>
    %73 = vector.broadcast %72 : vector<1x128xf32> to vector<16x128xf32>
    %74 = arith.addf %71, %73 : vector<16x128xf32>
    %cst_24 = arith.constant 0.000000e+00 : f32
    %75 = vector.broadcast %cst_24 : f32 to vector<16x128xf32>
    %76 = arith.maximumf %74, %75 : vector<16x128xf32>
    %77 = vector.broadcast %4 : vector<16x1xf32> to vector<16x128xf32>
    %78 = arith.mulf %76, %77 : vector<16x128xf32>
    %79 = arith.truncf %78 : vector<16x128xf32> to vector<16x128xbf16>
    %c0_25 = arith.constant 0 : index
    %c0_26 = arith.constant 0 : index
    %80 = vector.load %arg7[%c0_25, %c0_26] : memref<128x256xbf16, #tpu.memory_space<vmem>>, vector<128x256xbf16>
    %cst_27 = arith.constant dense<0.000000e+00> : vector<16x256xf32>
    %81 = tpu.matmul %79, %80, %cst_27 {dimension_numbers = #tpu.dot_dimension_numbers<[1], [0], [0], [1], [0, 0, 1, 1], [], []>} : vector<16x128xbf16>, vector<128x256xbf16>, vector<16x256xf32> -> vector<16x256xf32>
    %82 = vector.extract_strided_slice %81 {offsets = [0, 0], sizes = [16, 128], strides = [1, 1]} : vector<16x256xf32> to vector<16x128xf32>
    %83 = vector.extract_strided_slice %81 {offsets = [0, 128], sizes = [16, 128], strides = [1, 1]} : vector<16x256xf32> to vector<16x128xf32>
    %c0_28 = arith.constant 0 : index
    %c0_29 = arith.constant 0 : index
    %84 = vector.load %arg8[%c0_28, %c0_29] : memref<1x128xf32, #tpu.memory_space<vmem>>, vector<1x128xf32>
    %85 = vector.broadcast %84 : vector<1x128xf32> to vector<16x128xf32>
    %86 = arith.addf %82, %85 : vector<16x128xf32>
    %87 = arith.truncf %83 : vector<16x128xf32> to vector<16x128xbf16>
    %cst_30 = arith.constant 0.000000e+00 : f32
    %88 = vector.broadcast %cst_30 : f32 to vector<16x128xf32>
    %cst_31 = arith.constant dense<0.000000e+00> : vector<16x128xf32>
    %89 = tpu.matmul %12, %87, %cst_31 {dimension_numbers = #tpu.dot_dimension_numbers<[1], [0], [0], [1], [0, 0, 1, 1], [], []>} : vector<16x16xbf16>, vector<16x128xbf16>, vector<16x128xf32> -> vector<16x128xf32>
    %90 = arith.addf %86, %89 : vector<16x128xf32>
    %cst_32 = arith.constant 0.000000e+00 : f32
    %91 = vector.broadcast %cst_32 : f32 to vector<16x128xf32>
    %92 = arith.maximumf %90, %91 : vector<16x128xf32>
    %cst_33 = arith.constant 0.000000e+00 : f32
    %93 = vector.shape_cast %14 : vector<16x1xi1> to vector<16x1xi1>
    %94 = vector.broadcast %93 : vector<16x1xi1> to vector<16x128xi1>
    %95 = vector.broadcast %cst_33 : f32 to vector<16x128xf32>
    %96 = arith.select %94, %92, %95 : vector<16x128xi1>, vector<16x128xf32>
    %97 = arith.maximumf %88, %96 : vector<16x128xf32>
    %cst_34 = arith.constant dense<0.000000e+00> : vector<16x128xf32>
    %98 = tpu.matmul %20, %87, %cst_34 {dimension_numbers = #tpu.dot_dimension_numbers<[1], [0], [0], [1], [0, 0, 1, 1], [], []>} : vector<16x16xbf16>, vector<16x128xbf16>, vector<16x128xf32> -> vector<16x128xf32>
    %99 = arith.addf %86, %98 : vector<16x128xf32>
    %cst_35 = arith.constant 0.000000e+00 : f32
    %100 = vector.broadcast %cst_35 : f32 to vector<16x128xf32>
    %101 = arith.maximumf %99, %100 : vector<16x128xf32>
    %cst_36 = arith.constant 0.000000e+00 : f32
    %102 = vector.shape_cast %22 : vector<16x1xi1> to vector<16x1xi1>
    %103 = vector.broadcast %102 : vector<16x1xi1> to vector<16x128xi1>
    %104 = vector.broadcast %cst_36 : f32 to vector<16x128xf32>
    %105 = arith.select %103, %101, %104 : vector<16x128xi1>, vector<16x128xf32>
    %106 = arith.maximumf %97, %105 : vector<16x128xf32>
    %cst_37 = arith.constant dense<0.000000e+00> : vector<128xf32>
    %107 = vector.multi_reduction <add>, %106, %cst_37 [0] : vector<16x128xf32> to vector<128xf32>
    %108 = vector.shape_cast %107 : vector<128xf32> to vector<1x128xf32>
    %cst_38 = arith.constant 6.250000e-02 : f32
    %109 = vector.broadcast %cst_38 : f32 to vector<1x128xf32>
    %110 = arith.mulf %108, %109 : vector<1x128xf32>
    %111 = vector.broadcast %110 : vector<1x128xf32> to vector<16x128xf32>
    %112 = arith.subf %106, %111 : vector<16x128xf32>
    %113 = vector.broadcast %4 : vector<16x1xf32> to vector<16x128xf32>
    %114 = arith.mulf %112, %113 : vector<16x128xf32>
    %115 = arith.mulf %114, %114 : vector<16x128xf32>
    %cst_39 = arith.constant dense<0.000000e+00> : vector<128xf32>
    %116 = vector.multi_reduction <add>, %115, %cst_39 [0] : vector<16x128xf32> to vector<128xf32>
    %117 = vector.shape_cast %116 : vector<128xf32> to vector<1x128xf32>
    %cst_40 = arith.constant 6.250000e-02 : f32
    %118 = vector.broadcast %cst_40 : f32 to vector<1x128xf32>
    %119 = arith.mulf %117, %118 : vector<1x128xf32>
    %c0_41 = arith.constant 0 : index
    %c0_42 = arith.constant 0 : index
    %120 = vector.load %arg9[%c0_41, %c0_42] : memref<1x128xf32, #tpu.memory_space<vmem>>, vector<1x128xf32>
    %cst_43 = arith.constant 9.99999974E-6 : f32
    %121 = vector.broadcast %cst_43 : f32 to vector<1x128xf32>
    %122 = arith.addf %119, %121 : vector<1x128xf32>
    %123 = math.rsqrt %122 : vector<1x128xf32>
    %124 = arith.mulf %120, %123 : vector<1x128xf32>
    %125 = vector.broadcast %124 : vector<1x128xf32> to vector<16x128xf32>
    %126 = arith.mulf %114, %125 : vector<16x128xf32>
    %c0_44 = arith.constant 0 : index
    %c0_45 = arith.constant 0 : index
    %127 = vector.load %arg10[%c0_44, %c0_45] : memref<1x128xf32, #tpu.memory_space<vmem>>, vector<1x128xf32>
    %128 = vector.broadcast %127 : vector<1x128xf32> to vector<16x128xf32>
    %129 = arith.addf %126, %128 : vector<16x128xf32>
    %cst_46 = arith.constant 0.000000e+00 : f32
    %130 = vector.broadcast %cst_46 : f32 to vector<16x128xf32>
    %131 = arith.maximumf %129, %130 : vector<16x128xf32>
    %132 = vector.broadcast %4 : vector<16x1xf32> to vector<16x128xf32>
    %133 = arith.mulf %131, %132 : vector<16x128xf32>
    %134 = arith.truncf %133 : vector<16x128xf32> to vector<16x128xbf16>
    %c0_47 = arith.constant 0 : index
    %c0_48 = arith.constant 0 : index
    %135 = vector.load %arg11[%c0_47, %c0_48] : memref<128x256xbf16, #tpu.memory_space<vmem>>, vector<128x256xbf16>
    %cst_49 = arith.constant dense<0.000000e+00> : vector<16x256xf32>
    %136 = tpu.matmul %134, %135, %cst_49 {dimension_numbers = #tpu.dot_dimension_numbers<[1], [0], [0], [1], [0, 0, 1, 1], [], []>} : vector<16x128xbf16>, vector<128x256xbf16>, vector<16x256xf32> -> vector<16x256xf32>
    %137 = vector.extract_strided_slice %136 {offsets = [0, 0], sizes = [16, 128], strides = [1, 1]} : vector<16x256xf32> to vector<16x128xf32>
    %138 = vector.extract_strided_slice %136 {offsets = [0, 128], sizes = [16, 128], strides = [1, 1]} : vector<16x256xf32> to vector<16x128xf32>
    %c0_50 = arith.constant 0 : index
    %c0_51 = arith.constant 0 : index
    %139 = vector.load %arg12[%c0_50, %c0_51] : memref<1x128xf32, #tpu.memory_space<vmem>>, vector<1x128xf32>
    %140 = vector.broadcast %139 : vector<1x128xf32> to vector<16x128xf32>
    %141 = arith.addf %137, %140 : vector<16x128xf32>
    %142 = arith.truncf %138 : vector<16x128xf32> to vector<16x128xbf16>
    %cst_52 = arith.constant 0.000000e+00 : f32
    %143 = vector.broadcast %cst_52 : f32 to vector<16x128xf32>
    %cst_53 = arith.constant dense<0.000000e+00> : vector<16x128xf32>
    %144 = tpu.matmul %12, %142, %cst_53 {dimension_numbers = #tpu.dot_dimension_numbers<[1], [0], [0], [1], [0, 0, 1, 1], [], []>} : vector<16x16xbf16>, vector<16x128xbf16>, vector<16x128xf32> -> vector<16x128xf32>
    %145 = arith.addf %141, %144 : vector<16x128xf32>
    %cst_54 = arith.constant 0.000000e+00 : f32
    %146 = vector.broadcast %cst_54 : f32 to vector<16x128xf32>
    %147 = arith.maximumf %145, %146 : vector<16x128xf32>
    %cst_55 = arith.constant 0.000000e+00 : f32
    %148 = vector.shape_cast %14 : vector<16x1xi1> to vector<16x1xi1>
    %149 = vector.broadcast %148 : vector<16x1xi1> to vector<16x128xi1>
    %150 = vector.broadcast %cst_55 : f32 to vector<16x128xf32>
    %151 = arith.select %149, %147, %150 : vector<16x128xi1>, vector<16x128xf32>
    %152 = arith.maximumf %143, %151 : vector<16x128xf32>
    %cst_56 = arith.constant dense<0.000000e+00> : vector<16x128xf32>
    %153 = tpu.matmul %20, %142, %cst_56 {dimension_numbers = #tpu.dot_dimension_numbers<[1], [0], [0], [1], [0, 0, 1, 1], [], []>} : vector<16x16xbf16>, vector<16x128xbf16>, vector<16x128xf32> -> vector<16x128xf32>
    %154 = arith.addf %141, %153 : vector<16x128xf32>
    %cst_57 = arith.constant 0.000000e+00 : f32
    %155 = vector.broadcast %cst_57 : f32 to vector<16x128xf32>
    %156 = arith.maximumf %154, %155 : vector<16x128xf32>
    %cst_58 = arith.constant 0.000000e+00 : f32
    %157 = vector.shape_cast %22 : vector<16x1xi1> to vector<16x1xi1>
    %158 = vector.broadcast %157 : vector<16x1xi1> to vector<16x128xi1>
    %159 = vector.broadcast %cst_58 : f32 to vector<16x128xf32>
    %160 = arith.select %158, %156, %159 : vector<16x128xi1>, vector<16x128xf32>
    %161 = arith.maximumf %152, %160 : vector<16x128xf32>
    %cst_59 = arith.constant dense<0.000000e+00> : vector<128xf32>
    %162 = vector.multi_reduction <add>, %161, %cst_59 [0] : vector<16x128xf32> to vector<128xf32>
    %163 = vector.shape_cast %162 : vector<128xf32> to vector<1x128xf32>
    %cst_60 = arith.constant 6.250000e-02 : f32
    %164 = vector.broadcast %cst_60 : f32 to vector<1x128xf32>
    %165 = arith.mulf %163, %164 : vector<1x128xf32>
    %166 = vector.broadcast %165 : vector<1x128xf32> to vector<16x128xf32>
    %167 = arith.subf %161, %166 : vector<16x128xf32>
    %168 = vector.broadcast %4 : vector<16x1xf32> to vector<16x128xf32>
    %169 = arith.mulf %167, %168 : vector<16x128xf32>
    %170 = arith.mulf %169, %169 : vector<16x128xf32>
    %cst_61 = arith.constant dense<0.000000e+00> : vector<128xf32>
    %171 = vector.multi_reduction <add>, %170, %cst_61 [0] : vector<16x128xf32> to vector<128xf32>
    %172 = vector.shape_cast %171 : vector<128xf32> to vector<1x128xf32>
    %cst_62 = arith.constant 6.250000e-02 : f32
    %173 = vector.broadcast %cst_62 : f32 to vector<1x128xf32>
    %174 = arith.mulf %172, %173 : vector<1x128xf32>
    %c0_63 = arith.constant 0 : index
    %c0_64 = arith.constant 0 : index
    %175 = vector.load %arg13[%c0_63, %c0_64] : memref<1x128xf32, #tpu.memory_space<vmem>>, vector<1x128xf32>
    %cst_65 = arith.constant 9.99999974E-6 : f32
    %176 = vector.broadcast %cst_65 : f32 to vector<1x128xf32>
    %177 = arith.addf %174, %176 : vector<1x128xf32>
    %178 = math.rsqrt %177 : vector<1x128xf32>
    %179 = arith.mulf %175, %178 : vector<1x128xf32>
    %180 = vector.broadcast %179 : vector<1x128xf32> to vector<16x128xf32>
    %181 = arith.mulf %169, %180 : vector<16x128xf32>
    %c0_66 = arith.constant 0 : index
    %c0_67 = arith.constant 0 : index
    %182 = vector.load %arg14[%c0_66, %c0_67] : memref<1x128xf32, #tpu.memory_space<vmem>>, vector<1x128xf32>
    %183 = vector.broadcast %182 : vector<1x128xf32> to vector<16x128xf32>
    %184 = arith.addf %181, %183 : vector<16x128xf32>
    %185 = vector.broadcast %4 : vector<16x1xf32> to vector<16x128xf32>
    %186 = arith.mulf %184, %185 : vector<16x128xf32>
    %c0_68 = arith.constant 0 : index
    %c0_69 = arith.constant 0 : index
    %187 = vector.load %arg1[%c0_68, %c0_69] : memref<1x16xi32, #tpu.memory_space<vmem>>, vector<1x16xi32>
    %188 = tpu.iota {dimensions = array<i32: 0>} : vector<8x16xi32>
    %189 = vector.broadcast %187 : vector<1x16xi32> to vector<8x16xi32>
    %190 = arith.cmpi eq, %189, %188 : vector<8x16xi32>
    %191 = arith.extui %190 : vector<8x16xi1> to vector<8x16xi32>
    %192 = arith.sitofp %191 : vector<8x16xi32> to vector<8x16xf32>
    %cst_70 = arith.constant dense<0.000000e+00> : vector<8xf32>
    %193 = vector.multi_reduction <add>, %192, %cst_70 [1] : vector<8x16xf32> to vector<8xf32>
    %194 = vector.shape_cast %193 : vector<8xf32> to vector<8x1xf32>
    %195 = arith.extui %190 : vector<8x16xi1> to vector<8x16xi32>
    %196 = arith.sitofp %195 : vector<8x16xi32> to vector<8x16xf32>
    %197 = arith.truncf %196 : vector<8x16xf32> to vector<8x16xbf16>
    %198 = arith.truncf %186 : vector<16x128xf32> to vector<16x128xbf16>
    %cst_71 = arith.constant dense<0.000000e+00> : vector<8x128xf32>
    %199 = tpu.matmul %197, %198, %cst_71 {dimension_numbers = #tpu.dot_dimension_numbers<[1], [0], [0], [1], [0, 0, 1, 1], [], []>} : vector<8x16xbf16>, vector<16x128xbf16>, vector<8x128xf32> -> vector<8x128xf32>
    %cst_72 = arith.constant 1.000000e+00 : f32
    %200 = vector.broadcast %cst_72 : f32 to vector<8x1xf32>
    %201 = arith.maximumf %194, %200 : vector<8x1xf32>
    %202 = vector.broadcast %201 : vector<8x1xf32> to vector<8x128xf32>
    %203 = arith.divf %199, %202 : vector<8x128xf32>
    %204 = arith.truncf %203 : vector<8x128xf32> to vector<8x128xbf16>
    %c0_73 = arith.constant 0 : index
    %c0_74 = arith.constant 0 : index
    %205 = vector.load %arg15[%c0_73, %c0_74] : memref<128x128xbf16, #tpu.memory_space<vmem>>, vector<128x128xbf16>
    %cst_75 = arith.constant dense<0.000000e+00> : vector<8x128xf32>
    %206 = tpu.matmul %204, %205, %cst_75 {dimension_numbers = #tpu.dot_dimension_numbers<[1], [0], [0], [1], [0, 0, 1, 1], [], []>} : vector<8x128xbf16>, vector<128x128xbf16>, vector<8x128xf32> -> vector<8x128xf32>
    %c0_76 = arith.constant 0 : index
    %c0_77 = arith.constant 0 : index
    %207 = vector.load %arg16[%c0_76, %c0_77] : memref<1x128xf32, #tpu.memory_space<vmem>>, vector<1x128xf32>
    %208 = vector.broadcast %207 : vector<1x128xf32> to vector<8x128xf32>
    %209 = arith.addf %206, %208 : vector<8x128xf32>
    %210 = tpu.iota {dimensions = array<i32: 1>} : vector<8x128xi32>
    %c2_i32 = arith.constant 2 : i32
    %211 = vector.broadcast %c2_i32 : i32 to vector<8x128xi32>
    %212 = arith.cmpi slt, %210, %211 : vector<8x128xi32>
    %cst_78 = arith.constant -1.000000e+30 : f32
    %213 = vector.broadcast %cst_78 : f32 to vector<8x128xf32>
    %214 = arith.select %212, %209, %213 : vector<8x128xi1>, vector<8x128xf32>
    %cst_79 = arith.constant dense<0xFF800000> : vector<8xf32>
    %215 = vector.multi_reduction <maximumf>, %214, %cst_79 [1] : vector<8x128xf32> to vector<8xf32>
    %216 = vector.shape_cast %215 : vector<8xf32> to vector<8x1xf32>
    %217 = vector.broadcast %216 : vector<8x1xf32> to vector<8x128xf32>
    %218 = arith.subf %214, %217 : vector<8x128xf32>
    %219 = math.exp %218 : vector<8x128xf32>
    %cst_80 = arith.constant dense<0.000000e+00> : vector<8xf32>
    %220 = vector.multi_reduction <add>, %219, %cst_80 [1] : vector<8x128xf32> to vector<8xf32>
    %221 = vector.shape_cast %220 : vector<8xf32> to vector<8x1xf32>
    %222 = vector.broadcast %221 : vector<8x1xf32> to vector<8x128xf32>
    %223 = arith.divf %219, %222 : vector<8x128xf32>
    %c0_81 = arith.constant 0 : index
    %c0_82 = arith.constant 0 : index
    %224 = vector.load %arg17[%c0_81, %c0_82] : memref<8x128xf32, #tpu.memory_space<vmem>>, vector<8x128xf32>
    tpu.vector_store %arg17[%c0_81, %c0_82], %223 {strides = array<i32>} : memref<8x128xf32, #tpu.memory_space<vmem>>, vector<8x128xf32>,
    return
  }
}

</mosaic_0001>

<bundles_post_ra>
// kernel: tpu_custom_call.1
= control target key start
LH: loop header
LB: loop body
LE: loop exit
PB: predicated region body
PF: predicated region fallthrough
CT: control target
= control target key end

     0   :  { %s2417_s0 = inlined_call_operand.vmem [shape: s32[16,8], index: 0, kind: input, shape index: {}]   ;;  %s2418_s1 = inlined_call_operand.hbm [shape: s32[1,16], index: 1, kind: input, shape index: {}]   ;;  %s2419_s2 = inlined_call_operand.vmem [shape: f32[16,128], index: 2, kind: input, shape index: {}]   ;;  %s2420_s3 = inlined_call_operand.hbm [shape: bf16[128,256], index: 3, kind: input, shape index: {}]   ;;  %s2421_s4 = inlined_call_operand.hbm [shape: f32[1,128], index: 4, kind: input, shape index: {}]   ;;  %s2422_s5 = inlined_call_operand.hbm [shape: f32[1,128], index: 5, kind: input, shape index: {}]   ;;  %s2423_s6 = inlined_call_operand.hbm [shape: f32[1,128], index: 6, kind: input, shape index: {}]   ;;  %s2424_s7 = inlined_call_operand.hbm [shape: bf16[128,256], index: 7, kind: input, shape index: {}]   ;;  %s2425_s8 = inlined_call_operand.hbm [shape: f32[1,128], index: 8, kind: input, shape index: {}]   ;;  %s2426_s9 = inlined_call_operand.hbm [shape: f32[1,128], index: 9, kind: input, shape index: {}]   ;;  %s2427_s10 = inlined_call_operand.hbm [shape: f32[1,128], index: 10, kind: input, shape index: {}]   ;;  %s2428_s11 = inlined_call_operand.hbm [shape: bf16[128,256], index: 11, kind: input, shape index: {}]   ;;  %s2429_s12 = inlined_call_operand.hbm [shape: f32[1,128], index: 12, kind: input, shape index: {}]   ;;  %s2430_s13 = inlined_call_operand.hbm [shape: f32[1,128], index: 13, kind: input, shape index: {}]   ;;  %s2431_s14 = inlined_call_operand.hbm [shape: f32[1,128], index: 14, kind: input, shape index: {}]   ;;  %s2432_s15 = inlined_call_operand.vmem [shape: bf16[128,128], index: 15, kind: input, shape index: {}]   ;;  %s2433_s16 = inlined_call_operand.vmem [shape: f32[1,128], index: 16, kind: input, shape index: {}]   ;;  %s2434_s17 = inlined_call_operand.hbm [shape: f32[8,128], index: 17, kind: output, shape index: {}]  }
   0x1   :  { %2438 = sst [smem:[#allocation32_spill]] %s2417_s0 }
   0x2   :  { %2439 = sst [smem:[#allocation33_spill]] %s2418_s1 }
   0x3   :  { %2440 = sst [smem:[#allocation34_spill]] %s2434_s17 }
   0x4   :  { %22 = vsyncpa [#allocation3], 0 }
   0x5   :  { %23 = vsyncpa [#allocation6], 0 }
   0x6   :  { %24 = vsyncpa [#allocation9], 0 }
   0x7   :  { %25 = vsyncpa [#allocation12], 0 }
   0x8   :  { %26 = vsyncpa [#allocation15], 0 }
   0x9   :  { %27 = vsyncpa [#allocation18], 0 }
   0xa   :  { %28 = vsyncpa [#allocation21], 0 }
   0xb   :  { %29 = vsyncpa [#allocation4], 0  ;;  %s1971_s24 = smov [#allocation5]   ;;  %s1647_s28 = scalar_lea.hbm %s2420_s3, 2048 }
   0xc   :  { %s49_s25 = sshll.u32 %s1971_s24, 4  ;;  %p1648_p0 = scmp.ne.s32.totalorder %s2420_s3, %s1647_s28  ;;  %s50_s25 = int_to_ptr.vmem [resolvable:$true] %s49_s25 }
   0xd   :  { %p1651_p1 = scmp.lt.u32.totalorder %s1647_s28, %s2420_s3 }
   0xf   :  { %p1653_p2 = pnand %p1651_p1, %p1648_p0 }
  0x11   :  { %1656 = shalt.err (!%p1653_p2)
}
  0x12   :  { %s1657_s19 = scalar_lea.vmem %s50_s25, 2048  ;;  %p1662_p4 = scmp.lt.s32.totalorder %s50_s25, %s50_s25 }
  0x13   :  { %p1658_p3 = scmp.ne.s32.totalorder %s50_s25, %s1657_s19  ;;  %p1663_p5 = scmp.lt.s32.totalorder %s1657_s19, %s1657_s19 }
  0x15   :  { %p1664_p6 = por %p1663_p5, %p1662_p4 }
  0x17   :  { %p1665_p7 = pnand %p1664_p6, %p1658_p3 }
  0x19   :  { %1668 = shalt.err (!%p1665_p7)
}
  0x1a   :  { %s1972_s1 = smov 128   ;;  %s1973_s20 = smov 8  }
  0x1b   :  { %55 = dma.hbm_to_vmem [thread:$0]  %s2420_s3, 2048, %s50_s25, [#allocation6], %s1972_s1, %s1972_s1, %s1973_s20  }
  0x1c   :  { %s1974_s23 = smov [#allocation8]   ;;  %s1975_s26 = smov [#allocation11]  }
  0x1d   :  { %s72_s24 = sshll.u32 %s1974_s23, 4  ;;  %s91_s27 = sshll.u32 %s1975_s26, 4  ;;  %s73_s24 = int_to_ptr.vmem [resolvable:$true] %s72_s24  ;;  %s92_s27 = int_to_ptr.vmem [resolvable:$true] %s91_s27 }
  0x1e   :  { %s1669_s0 = scalar_lea.hbm %s2422_s5, 16 }
  0x1f   :  { %p1670_p8 = scmp.ne.s32.totalorder %s2422_s5, %s1669_s0  ;;  %p1673_p9 = scmp.lt.u32.totalorder %s1669_s0, %s2422_s5 }
  0x21   :  { %p1675_p10 = pnand %p1673_p9, %p1670_p8 }
  0x23   :  { %1678 = shalt.err (!%p1675_p10)
}
  0x24   :  { %s1679_s3 = scalar_lea.vmem %s73_s24, 16  ;;  %s1683_s25 = scalar_lea.vmem %s73_s24, 32 }
  0x25   :  { %p1680_p11 = scmp.ne.s32.totalorder %s73_s24, %s1679_s3  ;;  %p1684_p12 = scmp.lt.s32.totalorder %s73_s24, %s73_s24 }
  0x26   :  { %p1685_p13 = scmp.lt.s32.totalorder %s1683_s25, %s1679_s3 }
  0x28   :  { %p1686_p0 = por %p1685_p13, %p1684_p12 }
  0x2a   :  { %p1687_p1 = pnand %p1686_p0, %p1680_p11 }
  0x2c   :  { %1690 = shalt.err (!%p1687_p1)
}
  0x2d   :  { %75 = dma.hbm_to_vmem [thread:$0]  %s2422_s5, 16, %s73_s24, [#allocation9]  }
  0x2e   :  { %s1691_s17 = scalar_lea.hbm %s2424_s7, 2048 }
  0x2f   :  { %p1692_p2 = scmp.ne.s32.totalorder %s2424_s7, %s1691_s17  ;;  %p1695_p3 = scmp.lt.u32.totalorder %s1691_s17, %s2424_s7 }
  0x31   :  { %p1697_p4 = pnand %p1695_p3, %p1692_p2 }
  0x33   :  { %1700 = shalt.err (!%p1697_p4)
}
  0x34   :  { %s1701_s18 = scalar_lea.vmem %s92_s27, 2048  ;;  %p1706_p6 = scmp.lt.s32.totalorder %s92_s27, %s92_s27 }
  0x35   :  { %p1702_p5 = scmp.ne.s32.totalorder %s92_s27, %s1701_s18  ;;  %p1707_p7 = scmp.lt.s32.totalorder %s1701_s18, %s1701_s18 }
  0x37   :  { %p1708_p8 = por %p1707_p7, %p1706_p6 }
  0x39   :  { %p1709_p9 = pnand %p1708_p8, %p1702_p5 }
  0x3b   :  { %1712 = shalt.err (!%p1709_p9)
}
  0x3c   :  { %97 = dma.hbm_to_vmem [thread:$0]  %s2424_s7, 2048, %s92_s27, [#allocation12], %s1972_s1, %s1972_s1, %s1973_s20  }
  0x3d   :  { %s1976_s19 = smov [#allocation14]   ;;  %s1977_s25 = smov [#allocation17]  }
  0x3e   :  { %s114_s3 = sshll.u32 %s1976_s19, 4  ;;  %s133_s21 = sshll.u32 %s1977_s25, 4  ;;  %s115_s3 = int_to_ptr.vmem [resolvable:$true] %s114_s3  ;;  %s134_s21 = int_to_ptr.vmem [resolvable:$true] %s133_s21 }
  0x3f   :  { %s1713_s26 = scalar_lea.hbm %s2426_s9, 16 }
  0x40   :  { %p1714_p10 = scmp.ne.s32.totalorder %s2426_s9, %s1713_s26  ;;  %p1717_p11 = scmp.lt.u32.totalorder %s1713_s26, %s2426_s9 }
  0x42   :  { %p1719_p12 = pnand %p1717_p11, %p1714_p10 }
  0x44   :  { %1722 = shalt.err (!%p1719_p12)
}
  0x45   :  { %s1723_s7 = scalar_lea.vmem %s115_s3, 16  ;;  %s1727_s27 = scalar_lea.vmem %s115_s3, 32 }
  0x46   :  { %p1724_p13 = scmp.ne.s32.totalorder %s115_s3, %s1723_s7  ;;  %p1728_p0 = scmp.lt.s32.totalorder %s115_s3, %s115_s3 }
  0x47   :  { %p1729_p1 = scmp.lt.s32.totalorder %s1727_s27, %s1723_s7 }
  0x49   :  { %p1730_p2 = por %p1729_p1, %p1728_p0 }
  0x4b   :  { %p1731_p3 = pnand %p1730_p2, %p1724_p13 }
  0x4d   :  { %1734 = shalt.err (!%p1731_p3)
}
  0x4e   :  { %117 = dma.hbm_to_vmem [thread:$0]  %s2426_s9, 16, %s115_s3, [#allocation15]  }
  0x4f   :  { %s1735_s19 = scalar_lea.hbm %s2428_s11, 2048 }
  0x50   :  { %p1736_p4 = scmp.ne.s32.totalorder %s2428_s11, %s1735_s19  ;;  %p1739_p5 = scmp.lt.u32.totalorder %s1735_s19, %s2428_s11 }
  0x52   :  { %p1741_p6 = pnand %p1739_p5, %p1736_p4 }
  0x54   :  { %1744 = shalt.err (!%p1741_p6)
}
  0x55   :  { %s1745_s17 = scalar_lea.vmem %s134_s21, 2048  ;;  %p1750_p8 = scmp.lt.s32.totalorder %s134_s21, %s134_s21 }
  0x56   :  { %p1746_p7 = scmp.ne.s32.totalorder %s134_s21, %s1745_s17  ;;  %p1751_p9 = scmp.lt.s32.totalorder %s1745_s17, %s1745_s17 }
  0x58   :  { %p1752_p10 = por %p1751_p9, %p1750_p8 }
  0x5a   :  { %p1753_p11 = pnand %p1752_p10, %p1746_p7 }
  0x5c   :  { %1756 = shalt.err (!%p1753_p11)
}
  0x5d   :  { %139 = dma.hbm_to_vmem [thread:$0]  %s2428_s11, 2048, %s134_s21, [#allocation18], %s1972_s1, %s1972_s1, %s1973_s20  }
  0x5e   :  { %s1978_s28 = smov [#allocation20]   ;;  %s1979_s0 = smov [#allocation2]  }
  0x5f   :  { %s156_s29 = sshll.u32 %s1978_s28, 4  ;;  %s38_s7 = sshll.u32 %s1979_s0, 4  ;;  %s157_s29 = int_to_ptr.vmem [resolvable:$true] %s156_s29  ;;  %s39_s7 = int_to_ptr.vmem [resolvable:$true] %s38_s7 }
  0x60   :  { %s1757_s18 = scalar_lea.hbm %s2430_s13, 16 }
  0x61   :  { %p1758_p12 = scmp.ne.s32.totalorder %s2430_s13, %s1757_s18  ;;  %p1761_p13 = scmp.lt.u32.totalorder %s1757_s18, %s2430_s13 }
  0x63   :  { %p1763_p0 = pnand %p1761_p13, %p1758_p12 }
  0x65   :  { %1766 = shalt.err (!%p1763_p0)
}
  0x66   :  { %s1767_s11 = scalar_lea.vmem %s157_s29, 16  ;;  %s1771_s1 = scalar_lea.vmem %s157_s29, 32 }
  0x67   :  { %p1768_p1 = scmp.ne.s32.totalorder %s157_s29, %s1767_s11  ;;  %p1772_p2 = scmp.lt.s32.totalorder %s157_s29, %s157_s29 }
  0x68   :  { %p1773_p3 = scmp.lt.s32.totalorder %s1771_s1, %s1767_s11 }
  0x6a   :  { %p1774_p4 = por %p1773_p3, %p1772_p2 }
  0x6c   :  { %p1775_p5 = pnand %p1774_p4, %p1768_p1 }
  0x6e   :  { %1778 = shalt.err (!%p1775_p5)
}
  0x6f   :  { %159 = dma.hbm_to_vmem [thread:$0]  %s2430_s13, 16, %s157_s29, [#allocation21]  }
  0x70   :  { %s2441_s26 = sld [smem:[#allocation33_spill]] }
  0x76   :  { %s1779_s17 = scalar_lea.hbm %s2441_s26, 16 }
  0x77   :  { %p1780_p6 = scmp.ne.s32.totalorder %s2441_s26, %s1779_s17  ;;  %p1783_p7 = scmp.lt.u32.totalorder %s1779_s17, %s2441_s26 }
  0x79   :  { %p1785_p8 = pnand %p1783_p7, %p1780_p6 }
  0x7b   :  { %1788 = shalt.err (!%p1785_p8)
}
  0x7c   :  { %s1789_s27 = scalar_lea.vmem %s39_s7, 16  ;;  %s1793_s30 = scalar_lea.vmem %s39_s7, 32 }
  0x7d   :  { %p1790_p9 = scmp.ne.s32.totalorder %s39_s7, %s1789_s27  ;;  %p1794_p10 = scmp.lt.s32.totalorder %s39_s7, %s39_s7 }
  0x7e   :  { %p1795_p11 = scmp.lt.s32.totalorder %s1793_s30, %s1789_s27 }
  0x80   :  { %p1796_p12 = por %p1795_p11, %p1794_p10 }
  0x82   :  { %p1797_p13 = pnand %p1796_p12, %p1790_p9 }
  0x84   :  { %1800 = shalt.err (!%p1797_p13)
}
  0x85   :  { %41 = dma.hbm_to_vmem [thread:$0]  %s2441_s26, 16, %s39_s7, [#allocation3]  }
  0x86   :  { %s1980_s18 = smov [#allocation7]   ;;  %s1981_s24 = smov [#allocation10]  }
  0x87   :  { %s62_s5 = sshll.u32 %s1980_s18, 4  ;;  %s82_s19 = sshll.u32 %s1981_s24, 4  ;;  %s63_s5 = int_to_ptr.vmem [resolvable:$true] %s62_s5  ;;  %s83_s19 = int_to_ptr.vmem [resolvable:$true] %s82_s19 }
  0x88   :  { %s1801_s1 = scalar_lea.hbm %s2421_s4, 16 }
  0x89   :  { %p1802_p0 = scmp.ne.s32.totalorder %s2421_s4, %s1801_s1  ;;  %p1805_p1 = scmp.lt.u32.totalorder %s1801_s1, %s2421_s4 }
  0x8b   :  { %p1807_p2 = pnand %p1805_p1, %p1802_p0 }
  0x8d   :  { %1810 = shalt.err (!%p1807_p2)
}
  0x8e   :  { %s1811_s7 = scalar_lea.vmem %s63_s5, 16  ;;  %s1815_s26 = scalar_lea.vmem %s63_s5, 32 }
  0x8f   :  { %p1812_p3 = scmp.ne.s32.totalorder %s63_s5, %s1811_s7  ;;  %p1816_p4 = scmp.lt.s32.totalorder %s63_s5, %s63_s5 }
  0x90   :  { %p1817_p5 = scmp.lt.s32.totalorder %s1815_s26, %s1811_s7 }
  0x92   :  { %p1818_p6 = por %p1817_p5, %p1816_p4 }
  0x94   :  { %p1819_p7 = pnand %p1818_p6, %p1812_p3 }
  0x96   :  { %1822 = shalt.err (!%p1819_p7)
}
  0x97   :  { %65 = dma.hbm_to_vmem [thread:$0]  %s2421_s4, 16, %s63_s5, [#allocation6]  }
  0x98   :  { %s1823_s0 = scalar_lea.hbm %s2423_s6, 16 }
  0x99   :  { %p1824_p8 = scmp.ne.s32.totalorder %s2423_s6, %s1823_s0  ;;  %p1827_p9 = scmp.lt.u32.totalorder %s1823_s0, %s2423_s6 }
  0x9b   :  { %p1829_p10 = pnand %p1827_p9, %p1824_p8 }
  0x9d   :  { %1832 = shalt.err (!%p1829_p10)
}
  0x9e   :  { %s1833_s18 = scalar_lea.vmem %s83_s19, 16  ;;  %s1837_s24 = scalar_lea.vmem %s83_s19, 32 }
  0x9f   :  { %p1834_p11 = scmp.ne.s32.totalorder %s83_s19, %s1833_s18  ;;  %p1838_p12 = scmp.lt.s32.totalorder %s83_s19, %s83_s19 }
  0xa0   :  { %p1839_p13 = scmp.lt.s32.totalorder %s1837_s24, %s1833_s18 }
  0xa2   :  { %p1840_p0 = por %p1839_p13, %p1838_p12 }
  0xa4   :  { %p1841_p1 = pnand %p1840_p0, %p1834_p11 }
  0xa6   :  { %1844 = shalt.err (!%p1841_p1)
}
  0xa7   :  { %85 = dma.hbm_to_vmem [thread:$0]  %s2423_s6, 16, %s83_s19, [#allocation9]  }
  0xa8   :  { %s1982_s25 = smov [#allocation13]   ;;  %s1983_s1 = smov [#allocation16]  }
  0xa9   :  { %s104_s11 = sshll.u32 %s1982_s25, 4  ;;  %s124_s20 = sshll.u32 %s1983_s1, 4  ;;  %s105_s11 = int_to_ptr.vmem [resolvable:$true] %s104_s11  ;;  %s125_s20 = int_to_ptr.vmem [resolvable:$true] %s124_s20 }
  0xaa   :  { %s1845_s23 = scalar_lea.hbm %s2425_s8, 16 }
  0xab   :  { %p1846_p2 = scmp.ne.s32.totalorder %s2425_s8, %s1845_s23  ;;  %p1849_p3 = scmp.lt.u32.totalorder %s1845_s23, %s2425_s8 }
  0xad   :  { %p1851_p4 = pnand %p1849_p3, %p1846_p2 }
  0xaf   :  { %1854 = shalt.err (!%p1851_p4)
}
  0xb0   :  { %s1855_s6 = scalar_lea.vmem %s105_s11, 16  ;;  %s1859_s19 = scalar_lea.vmem %s105_s11, 32 }
  0xb1   :  { %p1856_p5 = scmp.ne.s32.totalorder %s105_s11, %s1855_s6  ;;  %p1860_p6 = scmp.lt.s32.totalorder %s105_s11, %s105_s11 }
  0xb2   :  { %p1861_p7 = scmp.lt.s32.totalorder %s1859_s19, %s1855_s6 }
  0xb4   :  { %p1862_p8 = por %p1861_p7, %p1860_p6 }
  0xb6   :  { %p1863_p9 = pnand %p1862_p8, %p1856_p5 }
  0xb8   :  { %1866 = shalt.err (!%p1863_p9)
}
  0xb9   :  { %107 = dma.hbm_to_vmem [thread:$0]  %s2425_s8, 16, %s105_s11, [#allocation12]  }
  0xba   :  { %s1867_s30 = scalar_lea.hbm %s2427_s10, 16 }
  0xbb   :  { %p1868_p10 = scmp.ne.s32.totalorder %s2427_s10, %s1867_s30  ;;  %p1871_p11 = scmp.lt.u32.totalorder %s1867_s30, %s2427_s10 }
  0xbd   :  { %p1873_p12 = pnand %p1871_p11, %p1868_p10 }
  0xbf   :  { %1876 = shalt.err (!%p1873_p12)
}
  0xc0   :  { %s1877_s4 = scalar_lea.vmem %s125_s20, 16  ;;  %s1881_s5 = scalar_lea.vmem %s125_s20, 32 }
  0xc1   :  { %p1878_p13 = scmp.ne.s32.totalorder %s125_s20, %s1877_s4  ;;  %p1882_p0 = scmp.lt.s32.totalorder %s125_s20, %s125_s20 }
  0xc2   :  { %p1883_p1 = scmp.lt.s32.totalorder %s1881_s5, %s1877_s4 }
  0xc4   :  { %p1884_p2 = por %p1883_p1, %p1882_p0 }
  0xc6   :  { %p1885_p3 = pnand %p1884_p2, %p1878_p13 }
  0xc8   :  { %1888 = shalt.err (!%p1885_p3)
}
  0xc9   :  { %127 = dma.hbm_to_vmem [thread:$0]  %s2427_s10, 16, %s125_s20, [#allocation15]  }
  0xca   :  { %s1984_s11 = smov [#allocation19]   ;;  %s1985_s21 = smov [#allocation22]  }
  0xcb   :  { %s146_s1 = sshll.u32 %s1984_s11, 4  ;;  %s166_s22 = sshll.u32 %s1985_s21, 4  ;;  %s147_s1 = int_to_ptr.vmem [resolvable:$true] %s146_s1  ;;  %s167_s22 = int_to_ptr.vmem [resolvable:$true] %s166_s22 }
  0xcc   :  { %s1889_s26 = scalar_lea.hbm %s2429_s12, 16 }
  0xcd   :  { %p1890_p4 = scmp.ne.s32.totalorder %s2429_s12, %s1889_s26  ;;  %p1893_p5 = scmp.lt.u32.totalorder %s1889_s26, %s2429_s12 }
  0xcf   :  { %p1895_p6 = pnand %p1893_p5, %p1890_p4 }
  0xd1   :  { %1898 = shalt.err (!%p1895_p6)
}
  0xd2   :  { %s1899_s10 = scalar_lea.vmem %s147_s1, 16  ;;  %s1903_s20 = scalar_lea.vmem %s147_s1, 32 }
  0xd3   :  { %p1900_p7 = scmp.ne.s32.totalorder %s147_s1, %s1899_s10  ;;  %p1904_p8 = scmp.lt.s32.totalorder %s147_s1, %s147_s1 }
  0xd4   :  { %p1905_p9 = scmp.lt.s32.totalorder %s1903_s20, %s1899_s10 }
  0xd6   :  { %p1906_p10 = por %p1905_p9, %p1904_p8 }
  0xd8   :  { %p1907_p11 = pnand %p1906_p10, %p1900_p7 }
  0xda   :  { %1910 = shalt.err (!%p1907_p11)
}
  0xdb   :  { %149 = dma.hbm_to_vmem [thread:$0]  %s2429_s12, 16, %s147_s1, [#allocation18]  }
  0xdc   :  { %s1911_s30 = scalar_lea.hbm %s2431_s14, 16 }
  0xdd   :  { %p1912_p12 = scmp.ne.s32.totalorder %s2431_s14, %s1911_s30  ;;  %p1915_p13 = scmp.lt.u32.totalorder %s1911_s30, %s2431_s14 }
  0xdf   :  { %p1917_p0 = pnand %p1915_p13, %p1912_p12 }
  0xe1   :  { %1920 = shalt.err (!%p1917_p0)
}
  0xe2   :  { %s1921_s4 = scalar_lea.vmem %s167_s22, 16  ;;  %s1925_s5 = scalar_lea.vmem %s167_s22, 32 }
  0xe3   :  { %p1922_p1 = scmp.ne.s32.totalorder %s167_s22, %s1921_s4  ;;  %p1926_p2 = scmp.lt.s32.totalorder %s167_s22, %s167_s22 }
  0xe4   :  { %p1927_p3 = scmp.lt.s32.totalorder %s1925_s5, %s1921_s4 }
  0xe6   :  { %p1928_p4 = por %p1927_p3, %p1926_p2 }
  0xe8   :  { %p1929_p5 = pnand %p1928_p4, %p1922_p1 }
  0xea   :  { %1932 = shalt.err (!%p1929_p5)
}
  0xeb   :  { %169 = dma.hbm_to_vmem [thread:$0]  %s2431_s14, 16, %s167_s22, [#allocation21]  }
  0xec   :  { %1955 = dma.done.wait [#allocation3], 16  }
  0xed   :  { %1956 = vsyncadd [#allocation3], 4294967280 }
  0xee   :  { %1957 = dma.done.wait [#allocation6], 2064  }
  0xef   :  { %1958 = vsyncadd [#allocation6], 4294965232 }
  0xf0   :  { %1959 = dma.done.wait [#allocation9], 32  }
  0xf1   :  { %1960 = vsyncadd [#allocation9], 4294967264 }
  0xf2   :  { %1961 = dma.done.wait [#allocation12], 2064  }
  0xf3   :  { %1962 = vsyncadd [#allocation12], 4294965232 }
  0xf4   :  { %1963 = dma.done.wait [#allocation15], 32  }
  0xf5   :  { %1964 = vsyncadd [#allocation15], 4294967264 }
  0xf6   :  { %1965 = dma.done.wait [#allocation18], 2064  }
  0xf7   :  { %1966 = vsyncadd [#allocation18], 4294965232 }
  0xf8   :  { %1967 = dma.done.wait [#allocation21], 32  }
  0xf9   :  { %1968 = vsyncadd [#allocation21], 4294967264  ;;  %v1986_v0 = vmov 0   ;;  %v1987_v1 = vmov 1   ;;  %v1988_v2 = vmov 0.0   ;;  %s2442_s11 = sld [smem:[#allocation32_spill]]  ;;  %v214_v26 = vlaneseq }
  0xfa   :  { %386 = vmatprep.mubr.bf16.mxu0 %v1986_v0  ;;  %1550 = vset.pattern.permute.xlu0 %v1986_v0  ;;  %v1555_v3 = vld [vmem:[#allocation5 + $0x4] ss:$8 sps:$4 sm:$0xff]   ;;  %v1557_v4 = vld [vmem:[#allocation5] ss:$8 sps:$4 sm:$0xff]   ;;  %v1558_v5 = vld [vmem:[#allocation5 + $0x14] ss:$8 sps:$4 sm:$0xff]  }
  0xfb   :  { %1551 = vset.pattern.permute.xlu1 %v1987_v1  ;;  %1468 = vmatprep.subr.bf16.mxu1 %v1988_v2  ;;  %v1560_v6 = vld [vmem:[#allocation5 + $0x10] ss:$8 sps:$4 sm:$0xff]   ;;  %v1561_v7 = vld [vmem:[#allocation5 + $0x24] ss:$8 sps:$4 sm:$0xff]   ;;  %v1563_v8 = vld [vmem:[#allocation5 + $0x20] ss:$8 sps:$4 sm:$0xff]  }
  0xfc   :  { %354 = vmatprep.subr.bf16.mxu0 %v1555_v3  ;;  %v1564_v9 = vld [vmem:[#allocation5 + $0x34] ss:$8 sps:$4 sm:$0xff]   ;;  %v1566_v10 = vld [vmem:[#allocation5 + $0x30] ss:$8 sps:$4 sm:$0xff]   ;;  %v1567_v11 = vld [vmem:[#allocation5 + $0x44] ss:$8 sps:$4 sm:$0xff]  }
  0xfd   :  { %355 = vmatpush1.bf16.msra.mxu0 %v1557_v4  ;;  %v1569_v14 = vld [vmem:[#allocation5 + $0x40] ss:$8 sps:$4 sm:$0xff]   ;;  %v1570_v15 = vld [vmem:[#allocation5 + $0x54] ss:$8 sps:$4 sm:$0xff]   ;;  %v1572_v16 = vld [vmem:[#allocation5 + $0x50] ss:$8 sps:$4 sm:$0xff]  }
  0xfe   :  { %356 = vmatprep.subr.bf16.mxu0 %v1558_v5  ;;  %v1573_v18 = vld [vmem:[#allocation5 + $0x64] ss:$8 sps:$4 sm:$0xff]   ;;  %v1575_v19 = vld [vmem:[#allocation5 + $0x60] ss:$8 sps:$4 sm:$0xff]   ;;  %v1576_v20 = vld [vmem:[#allocation5 + $0x74] ss:$8 sps:$4 sm:$0xff]  }
  0xff   :  { %v225_v12 = vld [vmem:[%s2442_s11] sm:$0xff]  ;;  %v226_v13 = vld [vmem:[%s2442_s11 + $0x8] sm:$0xff]  ;;  %vm1989_vm1 = vmmov 0   ;;  %v2270_v28 = vand.u32 127, %v214_v26  ;;  %vm407_vm5 = vcmask 130048  }
 0x100   :  { %228 = vperm.xlu0 %1550, %v225_v12   ;;  %243 = vperm.xlu1 %1551, %v225_v12   ;;  %vm240_vm0 = vcmp.ge.s32.totalorder %v225_v12, 0  ;;  %v1578_v21 = vld [vmem:[#allocation5 + $0x70] ss:$8 sps:$4 sm:$0xff]   ;;  %vm241_vm2 = vcmp.ge.s32.totalorder %v226_v13, 0  ;;  %v1389_v59 = vld [vmem:[#allocation7] ss:$0 sm:$0xff] }
 0x101   :  { %357 = vmatpush1.bf16.msra.mxu0 %v1560_v6  ;;  %v456_v17 = vsel %vm240_vm0, 1, %v1986_v0  ;;  %v255_v22 = vld [vmem:[%s2419_s2] sm:$0xff]  ;;  %v256_v23 = vld [vmem:[%s2419_s2 + $0x8] sm:$0xff]  ;;  %1470 = vmatprep.mubr.msk.bf16.mxu1 %vm1989_vm1, %v1988_v2  ;;  %v457_v25 = vsel %vm241_vm2, 1, %v1986_v0  ;;  %vm1336_vm13 = vcmp.lt.s32.totalorder %v2270_v28, 2 }
 0x102   :  { %358 = vmatprep.subr.bf16.mxu0 %v1561_v7  ;;  %v257_v24 = vpack.c.bf16 %v256_v23, %v255_v22  ;;  %v1581_v43 = vld [vmem:[#allocation11 + $0x4] ss:$8 sps:$4 sm:$0xff]   ;;  %v1579_v44 = vld [vmem:[#allocation11] ss:$8 sps:$4 sm:$0xff]   ;;  %v1584_v45 = vld [vmem:[#allocation11 + $0x14] ss:$8 sps:$4 sm:$0xff]  }
 0x103   :  { %v1582_v46 = vld [vmem:[#allocation11 + $0x10] ss:$8 sps:$4 sm:$0xff]   ;;  %v1587_v47 = vld [vmem:[#allocation11 + $0x24] ss:$8 sps:$4 sm:$0xff]   ;;  %v1585_v48 = vld [vmem:[#allocation11 + $0x20] ss:$8 sps:$4 sm:$0xff]  }
 0x104   :  { %231 = vperm.xlu0 %1550, %v226_v13   ;;  %246 = vperm.xlu1 %1551, %v226_v13   ;;  %v1590_v49 = vld [vmem:[#allocation11 + $0x34] ss:$8 sps:$4 sm:$0xff]   ;;  %v1588_v50 = vld [vmem:[#allocation11 + $0x30] ss:$8 sps:$4 sm:$0xff]   ;;  %v1593_v51 = vld [vmem:[#allocation11 + $0x44] ss:$8 sps:$4 sm:$0xff]  }
 0x105   :  { %359 = vmatpush1.bf16.msra.mxu0 %v1563_v8  ;;  %v1591_v52 = vld [vmem:[#allocation11 + $0x40] ss:$8 sps:$4 sm:$0xff]   ;;  %v1596_v53 = vld [vmem:[#allocation11 + $0x54] ss:$8 sps:$4 sm:$0xff]   ;;  %v1594_v54 = vld [vmem:[#allocation11 + $0x50] ss:$8 sps:$4 sm:$0xff]  }
 0x106   :  { %360 = vmatprep.subr.bf16.mxu0 %v1564_v9  ;;  %v1599_v55 = vld [vmem:[#allocation11 + $0x64] ss:$8 sps:$4 sm:$0xff]   ;;  %v1597_v56 = vld [vmem:[#allocation11 + $0x60] ss:$8 sps:$4 sm:$0xff]   ;;  %v1600_v57 = vld [vmem:[#allocation11 + $0x70] ss:$8 sps:$4 sm:$0xff]  }
 0x107   :  { %v1602_v58 = vld [vmem:[#allocation11 + $0x74] ss:$8 sps:$4 sm:$0xff]  }
 0x108   :  { %459 = vperm.xlu0 %1550, %v456_v17   ;;  %1552 = vset.pattern.permute.xlu1 %v1986_v0 }
 0x109   :  { %361 = vmatpush1.bf16.msra.mxu0 %v1566_v10  ;;  %462 = vperm.xlu1 %1552, %v457_v25  }
 0x10a   :  { %362 = vmatprep.subr.bf16.mxu0 %v1567_v11 }
 0x10c   :  { %1553 = vset.pattern.permute.xlu0 %v1987_v1 }
 0x10d   :  { %363 = vmatpush1.bf16.msra.mxu0 %v1569_v14  ;;  %519 = vperm.xlu0 %1553, %v456_v17  }
 0x10e   :  { %364 = vmatprep.subr.bf16.mxu0 %v1570_v15  ;;  %1554 = vset.pattern.permute.xlu1 %v1987_v1 }
 0x10f   :  { %522 = vperm.xlu1 %1554, %v457_v25  }
 0x111   :  { %365 = vmatpush1.bf16.msra.mxu0 %v1572_v16 }
 0x112   :  { %366 = vmatprep.subr.bf16.mxu0 %v1573_v18 }
 0x115   :  { %367 = vmatpush1.bf16.msra.mxu0 %v1575_v19 }
 0x116   :  { %368 = vmatprep.subr.bf16.mxu0 %v1576_v20 }
 0x119   :  { %369 = vmatpush1.bf16.msra.mxu0 %v1578_v21 }
 0x11a   :  { %1492 = vmatprep.subr.bf16.mxu0 %v1988_v2 }
 0x11c   :  { %387 = vmatmul.mubr.bf16.vlgmr.msra.gmra.mrb[0].mxu0 %v257_v24 }
 0x11d   :  { %1494 = vmatprep.mubr.msk.bf16.mxu0 %vm1989_vm1, %v1988_v2 }
 0x17f   :  { %v229_v27 = vpop.permute.xlu0 %228  ;;  %v244_v29 = vpop.permute.xlu1 %243 }
 0x180   :  { %vm233_vm3 = vcmp.eq.s32.totalorder %v229_v27, %v2270_v28  ;;  %vm248_vm6 = vcmp.eq.s32.totalorder %v244_v29, %v2270_v28 }
 0x181   :  { %v1369_v35 = vsel %vm233_vm3, 1.0, %v1988_v2  ;;  %v1371_v40 = vsel %vm248_vm6, 1.0, %v1988_v2 }
 0x183   :  { %v232_v30 = vpop.permute.xlu0 %231  ;;  %v247_v38 = vpop.permute.xlu1 %246 }
 0x184   :  { %vm234_vm4 = vcmp.eq.s32.totalorder %v232_v30, %v2270_v28  ;;  %vm249_vm7 = vcmp.eq.s32.totalorder %v247_v38, %v2270_v28 }
 0x185   :  { %v1370_v36 = vsel %vm234_vm4, 1.0, %v1988_v2  ;;  %v1372_v41 = vsel %vm249_vm7, 1.0, %v1988_v2 }
 0x186   :  { %v2276_v39 = vpack.c.bf16 %v1370_v36, %v1369_v35  ;;  %v2287_v42 = vpack.c.bf16 %v1372_v41, %v1371_v40 }
 0x187   :  { %v2293_v4 = vpop.permute.xlu0 %459 }
 0x188   :  { %v2295_v8 = vpop.permute.xlu1 %462  ;;  %vm464_vm8 = vcmp.eq.s32.totalorder %v2293_v4, 1 }
 0x189   :  { %vm465_vm9 = vcmp.eq.s32.totalorder %v2295_v8, 1 }
 0x18c   :  { %v2297_v10 = vpop.permute.xlu0 %519 }
 0x18d   :  { %vm524_vm10 = vcmp.eq.s32.totalorder %v2297_v10, 1 }
 0x18e   :  { %v2303_v15 = vpop.permute.xlu1 %522 }
 0x18f   :  { %vm525_vm11 = vcmp.eq.s32.totalorder %v2303_v15, 1 }
 0x1ef   :  { %v388_v31 = vpop.f32.mrb[0].mxu0 }
 0x1f0   :  { %v390_v32 = vpop.f32.mrb[1].mxu0  ;;  %v404_v60 = vadd.f32 %v1389_v59, %v388_v31 }
 0x1f1   :  { %v392_v33 = vpop.f32.mrb[2].mxu0 }
 0x1f2   :  { %v394_v34 = vpop.f32.mrb[3].mxu0  ;;  %v405_v62 = vadd.f32 %v1389_v59, %v392_v33  ;;  %v1392_v59 = vld [vmem:[#allocation10] ss:$0 sm:$0xff] }
 0x1f3   :  { %v406_v37 = vpack.c.bf16 %v394_v34, %v390_v32 }
 0x1f5   :  { %1469 = vmatpush3.bf16.msra.mxu1 %v406_v37 }
 0x1f6   :  { %1474 = vmatprep.subr.bf16.mxu1 %v1988_v2 }
 0x1f8   :  { %1471 = vmatmul.mubr.msk.bf16.vlgmr.msra.gmra.mrb[0].mxu1 %vm407_vm5, %v2276_v39 }
 0x1f9   :  { %1475 = vmatpush3.bf16.msra.mxu1 %v406_v37  ;;  %1476 = vmatprep.mubr.msk.bf16.mxu1 %vm1989_vm1, %v1988_v2 }
 0x1fa   :  { %674 = vmatprep.subr.bf16.mxu1 %v1581_v43 }
 0x200   :  { %1477 = vmatmul.mubr.msk.bf16.vlgmr.msra.gmra.mrb[4].mxu1 %vm407_vm5, %v2287_v42 }
 0x201   :  { %706 = vmatprep.mubr.bf16.mxu1 %v1986_v0  ;;  %675 = vmatpush1.bf16.msra.mxu1 %v1579_v44 }
 0x202   :  { %676 = vmatprep.subr.bf16.mxu1 %v1584_v45 }
 0x205   :  { %677 = vmatpush1.bf16.msra.mxu1 %v1582_v46 }
 0x206   :  { %678 = vmatprep.subr.bf16.mxu1 %v1587_v47 }
 0x209   :  { %679 = vmatpush1.bf16.msra.mxu1 %v1585_v48 }
 0x20a   :  { %680 = vmatprep.subr.bf16.mxu1 %v1590_v49 }
 0x20d   :  { %681 = vmatpush1.bf16.msra.mxu1 %v1588_v50 }
 0x20e   :  { %682 = vmatprep.subr.bf16.mxu1 %v1593_v51 }
 0x211   :  { %683 = vmatpush1.bf16.msra.mxu1 %v1591_v52 }
 0x212   :  { %684 = vmatprep.subr.bf16.mxu1 %v1596_v53  ;;  %v2314_v53 = vshrl.u32 %v214_v26, 7 }
 0x215   :  { %685 = vmatpush1.bf16.msra.mxu1 %v1594_v54  ;;  %v552_v54 = vld [vmem:[#allocation8] sm:$0x1] }
 0x216   :  { %686 = vmatprep.subr.bf16.mxu1 %v1599_v55  ;;  %v2317_v55 = vsub.s32 0, %v2314_v53 }
 0x219   :  { %687 = vmatpush1.bf16.msra.mxu1 %v1597_v56 }
 0x21a   :  { %688 = vmatprep.subr.bf16.mxu1 %v1602_v58 }
 0x21d   :  { %689 = vmatpush1.bf16.msra.mxu1 %v1600_v57 }
 0x21e   :  { %1480 = vmatprep.subr.bf16.mxu1 %v1988_v2 }
 0x2cb   :  { %v445_v61 = vpop.f32.mrb[0].mxu1 }
 0x2cc   :  { %v452_v63 = vadd.f32 %v445_v61, %v404_v60  ;;  %v1472_v1 = vpop.f32.mrb[1].mxu1 }
 0x2cd   :  { %v448_v3 = vpop.f32.mrb[2].mxu1 }
 0x2ce   :  { %v453_v5 = vadd.f32 %v448_v3, %v405_v62  ;;  %v1473_v6 = vpop.f32.mrb[3].mxu1  ;;  %v454_v7 = vmax.f32 %v452_v63, 0.0 }
 0x2d0   :  { %v455_v9 = vmax.f32 %v453_v5, 0.0  ;;  %v466_v12 = vsel %vm464_vm8, %v454_v7, 0.0 }
 0x2d1   :  { %v468_v21 = vmax.f32 %v466_v12, 0.0  ;;  %v1605_v12 = vld [vmem:[#allocation17 + $0x4] ss:$8 sps:$4 sm:$0xff]  }
 0x2d2   :  { %v467_v17 = vsel %vm465_vm9, %v455_v9, 0.0 }
 0x2d3   :  { %v507_v11 = vpop.f32.mrb[4].mxu1  ;;  %v469_v24 = vmax.f32 %v467_v17, 0.0  ;;  %v1611_v17 = vld [vmem:[#allocation17 + $0x24] ss:$8 sps:$4 sm:$0xff]  }
 0x2d4   :  { %v514_v13 = vadd.f32 %v507_v11, %v404_v60  ;;  %v1478_v14 = vpop.f32.mrb[5].mxu1 }
 0x2d5   :  { %v510_v16 = vpop.f32.mrb[6].mxu1  ;;  %v1608_v14 = vld [vmem:[#allocation17 + $0x14] ss:$8 sps:$4 sm:$0xff]  }
 0x2d6   :  { %v516_v18 = vmax.f32 %v514_v13, 0.0  ;;  %v515_v19 = vadd.f32 %v510_v16, %v405_v62  ;;  %v1479_v20 = vpop.f32.mrb[7].mxu1  ;;  %v1603_v13 = vld [vmem:[#allocation17] ss:$8 sps:$4 sm:$0xff]   ;;  %v1606_v16 = vld [vmem:[#allocation17 + $0x10] ss:$8 sps:$4 sm:$0xff]  }
 0x2d7   :  { %v1612_v20 = vld [vmem:[#allocation17 + $0x30] ss:$8 sps:$4 sm:$0xff]  }
 0x2d8   :  { %v517_v22 = vmax.f32 %v515_v19, 0.0  ;;  %v526_v23 = vsel %vm524_vm10, %v516_v18, 0.0  ;;  %v1609_v18 = vld [vmem:[#allocation17 + $0x20] ss:$8 sps:$4 sm:$0xff]   ;;  %v1614_v19 = vld [vmem:[#allocation17 + $0x34] ss:$8 sps:$4 sm:$0xff]  }
 0x2d9   :  { %v528_v25 = vmax.f32 %v468_v21, %v526_v23  ;;  %v1617_v21 = vld [vmem:[#allocation17 + $0x44] ss:$8 sps:$4 sm:$0xff]   ;;  %v1618_v23 = vld [vmem:[#allocation17 + $0x50] ss:$8 sps:$4 sm:$0xff]  }
 0x2da   :  { %v527_v27 = vsel %vm525_vm11, %v517_v22, 0.0  ;;  %v1615_v22 = vld [vmem:[#allocation17 + $0x40] ss:$8 sps:$4 sm:$0xff]  }
 0x2db   :  { %v529_v29 = vmax.f32 %v469_v24, %v527_v27  ;;  %v1623_v24 = vld [vmem:[#allocation17 + $0x64] ss:$8 sps:$4 sm:$0xff]   ;;  %v1626_v27 = vld [vmem:[#allocation17 + $0x74] ss:$8 sps:$4 sm:$0xff]  }
 0x2dd   :  { %v530_v30 = vadd.f32 %v529_v29, %v528_v25 }
 0x2df   :  { %v531_v31 = vrot.slane %v530_v30, 4 }
 0x2e1   :  { %v532_v32 = vadd.f32 %v531_v31, %v530_v30  ;;  %v1409_v30 = vld [vmem:[#allocation13] ss:$0 sm:$0xff] }
 0x2e3   :  { %v533_v33 = vrot.slane %v532_v32, 2 }
 0x2e5   :  { %v534_v34 = vadd.f32 %v533_v33, %v532_v32 }
 0x2e7   :  { %v535_v35 = vrot.slane %v534_v34, 1 }
 0x2e9   :  { %v536_v36 = vadd.f32 %v535_v35, %v534_v34 }
 0x2eb   :  { %v537_v37 = vmul.f32 0.0625, %v536_v36 }
 0x2ed   :  { %v538_v38 = vsub.f32 %v528_v25, %v537_v37  ;;  %v539_v40 = vsub.f32 %v529_v29, %v537_v37  ;;  %v1621_v25 = vld [vmem:[#allocation17 + $0x60] ss:$8 sps:$4 sm:$0xff]   ;;  %v1624_v29 = vld [vmem:[#allocation17 + $0x70] ss:$8 sps:$4 sm:$0xff]  }
 0x2ef   :  { %v542_v41 = vmul.f32 %v538_v38, %v538_v38  ;;  %v543_v43 = vmul.f32 %v539_v40, %v539_v40 }
 0x2f1   :  { %v544_v44 = vadd.f32 %v543_v43, %v542_v41 }
 0x2f3   :  { %v545_v45 = vrot.slane %v544_v44, 4 }
 0x2f5   :  { %v546_v46 = vadd.f32 %v545_v45, %v544_v44 }
 0x2f7   :  { %v547_v47 = vrot.slane %v546_v46, 2 }
 0x2f9   :  { %v548_v48 = vadd.f32 %v547_v47, %v546_v46 }
 0x2fb   :  { %v549_v49 = vrot.slane %v548_v48, 1 }
 0x2fd   :  { %v550_v50 = vadd.f32 %v549_v49, %v548_v48 }
 0x2ff   :  { %v551_v51 = vmul.f32 0.0625, %v550_v50 }
 0x301   :  { %v553_v52 = vadd.f32 1e-05, %v551_v51 }
 0x303   :  { %1635 = vrsqrt.f32 %v553_v52 }
 0x30d   :  { %v1636_v56 = vpop.eup %1635 }
 0x30e   :  { %v555_v57 = vmul.f32 %v1636_v56, %v552_v54 }
 0x310   :  { %v560_v58 = vrot.slane %v555_v57, %v2317_v55 }
 0x312   :  { %v562_v60 = vmul.f32 %v560_v58, %v538_v38  ;;  %v563_v61 = vmul.f32 %v560_v58, %v539_v40 }
 0x314   :  { %v572_v62 = vadd.f32 %v1392_v59, %v563_v61  ;;  %v571_v63 = vadd.f32 %v1392_v59, %v562_v60 }
 0x316   :  { %v573_v1 = vmax.f32 %v571_v63, 0.0  ;;  %v574_v3 = vmax.f32 %v572_v62, 0.0 }
 0x318   :  { %v577_v5 = vpack.c.bf16 %v574_v3, %v573_v1 }
 0x31a   :  { %707 = vmatmul.mubr.bf16.vlgmr.msra.gmra.mrb[8].mxu1 %v577_v5 }
 0x31b   :  { %1482 = vmatprep.mubr.msk.bf16.mxu1 %vm1989_vm1, %v1988_v2 }
 0x3ed   :  { %v708_v26 = vpop.f32.mrb[8].mxu1 }
 0x3ee   :  { %v710_v6 = vpop.f32.mrb[9].mxu1  ;;  %v724_v31 = vadd.f32 %v1409_v30, %v708_v26 }
 0x3ef   :  { %v712_v7 = vpop.f32.mrb[10].mxu1 }
 0x3f0   :  { %v714_v9 = vpop.f32.mrb[11].mxu1  ;;  %v725_v33 = vadd.f32 %v1409_v30, %v712_v7 }
 0x3f1   :  { %v726_v11 = vpack.c.bf16 %v714_v9, %v710_v6 }
 0x3f3   :  { %1481 = vmatpush3.bf16.msra.mxu1 %v726_v11 }
 0x3f4   :  { %1486 = vmatprep.subr.bf16.mxu1 %v1988_v2 }
 0x3f6   :  { %1483 = vmatmul.mubr.msk.bf16.vlgmr.msra.gmra.mrb[12].mxu1 %vm407_vm5, %v2276_v39 }
 0x3f7   :  { %1487 = vmatpush3.bf16.msra.mxu1 %v726_v11  ;;  %1488 = vmatprep.mubr.msk.bf16.mxu1 %vm1989_vm1, %v1988_v2 }
 0x3f8   :  { %969 = vmatprep.subr.bf16.mxu1 %v1605_v12 }
 0x3fe   :  { %1489 = vmatmul.mubr.msk.bf16.vlgmr.msra.gmra.mrb[16].mxu1 %vm407_vm5, %v2287_v42 }
 0x3ff   :  { %1001 = vmatprep.mubr.bf16.mxu1 %v1986_v0  ;;  %970 = vmatpush1.bf16.msra.mxu1 %v1603_v13  ;;  %v1620_v0 = vld [vmem:[#allocation17 + $0x54] ss:$8 sps:$4 sm:$0xff]  }
 0x400   :  { %971 = vmatprep.subr.bf16.mxu1 %v1608_v14 }
 0x403   :  { %972 = vmatpush1.bf16.msra.mxu1 %v1606_v16 }
 0x404   :  { %973 = vmatprep.subr.bf16.mxu1 %v1611_v17 }
 0x407   :  { %974 = vmatpush1.bf16.msra.mxu1 %v1609_v18 }
 0x408   :  { %975 = vmatprep.subr.bf16.mxu1 %v1614_v19 }
 0x40b   :  { %976 = vmatpush1.bf16.msra.mxu1 %v1612_v20 }
 0x40c   :  { %977 = vmatprep.subr.bf16.mxu1 %v1617_v21 }
 0x40f   :  { %978 = vmatpush1.bf16.msra.mxu1 %v1615_v22 }
 0x410   :  { %979 = vmatprep.subr.bf16.mxu1 %v1620_v0  ;;  %v847_v0 = vld [vmem:[#allocation14] sm:$0x1] }
 0x413   :  { %980 = vmatpush1.bf16.msra.mxu1 %v1618_v23 }
 0x414   :  { %981 = vmatprep.subr.bf16.mxu1 %v1623_v24 }
 0x417   :  { %982 = vmatpush1.bf16.msra.mxu1 %v1621_v25 }
 0x418   :  { %983 = vmatprep.subr.bf16.mxu1 %v1626_v27  ;;  %v1412_v27 = vld [vmem:[#allocation16] ss:$0 sm:$0xff] }
 0x41b   :  { %984 = vmatpush1.bf16.msra.mxu1 %v1624_v29 }
 0x4c9   :  { %v761_v32 = vpop.f32.mrb[12].mxu1 }
 0x4ca   :  { %v768_v34 = vadd.f32 %v761_v32, %v724_v31  ;;  %v1484_v35 = vpop.f32.mrb[13].mxu1 }
 0x4cb   :  { %v764_v36 = vpop.f32.mrb[14].mxu1 }
 0x4cc   :  { %v769_v37 = vadd.f32 %v764_v36, %v725_v33  ;;  %v1485_v38 = vpop.f32.mrb[15].mxu1  ;;  %v770_v40 = vmax.f32 %v768_v34, 0.0 }
 0x4ce   :  { %v771_v41 = vmax.f32 %v769_v37, 0.0  ;;  %v772_v44 = vsel %vm464_vm8, %v770_v40, 0.0 }
 0x4cf   :  { %v774_v52 = vmax.f32 %v772_v44, 0.0 }
 0x4d0   :  { %v773_v48 = vsel %vm465_vm9, %v771_v41, 0.0 }
 0x4d1   :  { %v810_v43 = vpop.f32.mrb[16].mxu1  ;;  %v775_v57 = vmax.f32 %v773_v48, 0.0 }
 0x4d2   :  { %v817_v45 = vadd.f32 %v810_v43, %v724_v31  ;;  %v1490_v46 = vpop.f32.mrb[17].mxu1  ;;  %v1433_v43 = vld [vmem:[#allocation2] ss:$0 sm:$0xff] }
 0x4d3   :  { %v813_v47 = vpop.f32.mrb[18].mxu1  ;;  %vm1170_vm12 = vcmp.eq.s32.totalorder %v1433_v43, %v2314_v53 }
 0x4d4   :  { %v819_v49 = vmax.f32 %v817_v45, 0.0  ;;  %v818_v50 = vadd.f32 %v813_v47, %v725_v33  ;;  %v1491_v51 = vpop.f32.mrb[19].mxu1  ;;  %v2351_v44 = vsel %vm1170_vm12, 1.0, %v1988_v2  ;;  %v1429_v45 = vld [vmem:[#allocation19] ss:$0 sm:$0xff] }
 0x4d5   :  { %v1176_v43 = vpack.c.bf16 %v2351_v44, %v2351_v44 }
 0x4d6   :  { %v821_v54 = vsel %vm524_vm10, %v819_v49, 0.0  ;;  %v820_v56 = vmax.f32 %v818_v50, 0.0 }
 0x4d7   :  { %v823_v58 = vmax.f32 %v774_v52, %v821_v54 }
 0x4d8   :  { %v822_v59 = vsel %vm525_vm11, %v820_v56, 0.0 }
 0x4d9   :  { %v824_v60 = vmax.f32 %v775_v57, %v822_v59 }
 0x4db   :  { %v825_v61 = vadd.f32 %v824_v60, %v823_v58 }
 0x4dd   :  { %v826_v62 = vrot.slane %v825_v61, 4 }
 0x4df   :  { %v827_v63 = vadd.f32 %v826_v62, %v825_v61 }
 0x4e1   :  { %v828_v1 = vrot.slane %v827_v63, 2 }
 0x4e3   :  { %v829_v3 = vadd.f32 %v828_v1, %v827_v63 }
 0x4e5   :  { %v830_v5 = vrot.slane %v829_v3, 1 }
 0x4e7   :  { %v831_v26 = vadd.f32 %v830_v5, %v829_v3 }
 0x4e9   :  { %v832_v6 = vmul.f32 0.0625, %v831_v26 }
 0x4eb   :  { %v833_v7 = vsub.f32 %v823_v58, %v832_v6  ;;  %v834_v9 = vsub.f32 %v824_v60, %v832_v6 }
 0x4ed   :  { %v837_v11 = vmul.f32 %v833_v7, %v833_v7  ;;  %v838_v12 = vmul.f32 %v834_v9, %v834_v9 }
 0x4ef   :  { %v839_v13 = vadd.f32 %v838_v12, %v837_v11 }
 0x4f1   :  { %v840_v14 = vrot.slane %v839_v13, 4 }
 0x4f3   :  { %v841_v16 = vadd.f32 %v840_v14, %v839_v13 }
 0x4f5   :  { %v842_v17 = vrot.slane %v841_v16, 2 }
 0x4f7   :  { %v843_v18 = vadd.f32 %v842_v17, %v841_v16 }
 0x4f9   :  { %v844_v19 = vrot.slane %v843_v18, 1 }
 0x4fb   :  { %v845_v20 = vadd.f32 %v844_v19, %v843_v18 }
 0x4fd   :  { %v846_v21 = vmul.f32 0.0625, %v845_v20 }
 0x4ff   :  { %v848_v22 = vadd.f32 1e-05, %v846_v21 }
 0x501   :  { %1637 = vrsqrt.f32 %v848_v22 }
 0x50b   :  { %v1638_v23 = vpop.eup %1637 }
 0x50c   :  { %v850_v24 = vmul.f32 %v1638_v23, %v847_v0 }
 0x50e   :  { %v855_v25 = vrot.slane %v850_v24, %v2317_v55 }
 0x510   :  { %v858_v29 = vmul.f32 %v855_v25, %v834_v9  ;;  %v857_v30 = vmul.f32 %v855_v25, %v833_v7 }
 0x512   :  { %v866_v31 = vadd.f32 %v1412_v27, %v857_v30  ;;  %v867_v32 = vadd.f32 %v1412_v27, %v858_v29 }
 0x514   :  { %v868_v33 = vmax.f32 %v866_v31, 0.0  ;;  %v869_v34 = vmax.f32 %v867_v32, 0.0  ;;  %v1142_v31 = vld [vmem:[#allocation20] sm:$0x1] }
 0x516   :  { %v872_v35 = vpack.c.bf16 %v869_v34, %v868_v33 }
 0x518   :  { %1002 = vmatmul.mubr.bf16.vlgmr.msra.gmra.mrb[20].mxu1 %v872_v35  ;;  %v1432_v35 = vld [vmem:[#allocation22] ss:$0 sm:$0xff] }
 0x5eb   :  { %v1003_v36 = vpop.f32.mrb[20].mxu1 }
 0x5ec   :  { %v1005_v37 = vpop.f32.mrb[21].mxu1  ;;  %v1019_v46 = vadd.f32 %v1429_v45, %v1003_v36 }
 0x5ed   :  { %v1007_v38 = vpop.f32.mrb[22].mxu1 }
 0x5ee   :  { %v1009_v40 = vpop.f32.mrb[23].mxu1  ;;  %v1020_v48 = vadd.f32 %v1429_v45, %v1007_v38  ;;  %v1630_v45 = vld [vmem:[%s2432_s15 + $0x18] sm:$0xff]  }
 0x5ef   :  { %v1021_v41 = vpack.c.bf16 %v1009_v40, %v1005_v37 }
 0x5f1   :  { %1493 = vmatpush3.bf16.msra.mxu0 %v1021_v41 }
 0x5f2   :  { %1498 = vmatprep.subr.bf16.mxu0 %v1988_v2 }
 0x5f4   :  { %1495 = vmatmul.mubr.msk.bf16.vlgmr.msra.gmra.mrb[4].mxu0 %vm407_vm5, %v2276_v39  ;;  %v1173_v39 = vsel %vm407_vm5, %v2351_v44, 0.0  ;;  %v1629_v44 = vld [vmem:[%s2432_s15 + $0x10] sm:$0xff]  }
 0x5f5   :  { %1499 = vmatpush3.bf16.msra.mxu0 %v1021_v41  ;;  %1500 = vmatprep.mubr.msk.bf16.mxu0 %vm1989_vm1, %v1988_v2 }
 0x5f6   :  { %1504 = vmatprep.subr.bf16.mxu0 %v1988_v2  ;;  %1174 = vadd.xlane.f32.xlu1 %v1173_v39  ;;  %v1627_v39 = vld [vmem:[%s2432_s15] sm:$0xff]  }
 0x5fc   :  { %1501 = vmatmul.mubr.msk.bf16.vlgmr.msra.gmra.mrb[8].mxu0 %vm407_vm5, %v2287_v42 }
 0x5fd   :  { %1506 = vmatprep.mubr.msk.bf16.mxu0 %vm1989_vm1, %v1988_v2 }
 0x6c7   :  { %v1056_v47 = vpop.f32.mrb[4].mxu0 }
 0x6c8   :  { %v1063_v49 = vadd.f32 %v1056_v47, %v1019_v46  ;;  %v1496_v50 = vpop.f32.mrb[5].mxu0  ;;  %v1632_v47 = vld [vmem:[%s2432_s15 + $0x28] sm:$0xff]  }
 0x6c9   :  { %v1059_v42 = vpop.f32.mrb[6].mxu0  ;;  %v1175_v50 = vpop.xlane.xlu1 %1174 }
 0x6ca   :  { %v1064_v51 = vadd.f32 %v1059_v42, %v1020_v48  ;;  %v1497_v52 = vpop.f32.mrb[7].mxu0  ;;  %v1065_v54 = vmax.f32 %v1063_v49, 0.0  ;;  %v1634_v49 = vld [vmem:[%s2432_s15 + $0x38] sm:$0xff]   ;;  %v1221_v42 = vmax.f32 %v1175_v50, 1.0 }
 0x6cc   :  { %v1066_v56 = vmax.f32 %v1064_v51, 0.0  ;;  %v1067_v53 = vsel %vm464_vm8, %v1065_v54, 0.0 }
 0x6cd   :  { %v1069_v3 = vmax.f32 %v1067_v53, 0.0 }
 0x6ce   :  { %v1068_v61 = vsel %vm465_vm9, %v1066_v56, 0.0 }
 0x6cf   :  { %v1105_v57 = vpop.f32.mrb[8].mxu0  ;;  %v1070_v6 = vmax.f32 %v1068_v61, 0.0 }
 0x6d0   :  { %v1112_v58 = vadd.f32 %v1105_v57, %v1019_v46  ;;  %v1502_v59 = vpop.f32.mrb[9].mxu0  ;;  %v1631_v46 = vld [vmem:[%s2432_s15 + $0x20] sm:$0xff]  }
 0x6d1   :  { %v1108_v60 = vpop.f32.mrb[10].mxu0 }
 0x6d2   :  { %v1114_v62 = vmax.f32 %v1112_v58, 0.0  ;;  %v1113_v63 = vadd.f32 %v1108_v60, %v1020_v48  ;;  %v1503_v1 = vpop.f32.mrb[11].mxu0  ;;  %v1633_v48 = vld [vmem:[%s2432_s15 + $0x30] sm:$0xff]  }
 0x6d4   :  { %v1116_v5 = vsel %vm524_vm10, %v1114_v62, 0.0  ;;  %v1115_v26 = vmax.f32 %v1113_v63, 0.0 }
 0x6d5   :  { %v1118_v7 = vmax.f32 %v1069_v3, %v1116_v5 }
 0x6d6   :  { %v1117_v4 = vsel %vm525_vm11, %v1115_v26, 0.0 }
 0x6d7   :  { %v1119_v9 = vmax.f32 %v1070_v6, %v1117_v4 }
 0x6d9   :  { %v1120_v11 = vadd.f32 %v1119_v9, %v1118_v7 }
 0x6db   :  { %v1121_v12 = vrot.slane %v1120_v11, 4 }
 0x6dd   :  { %v1122_v13 = vadd.f32 %v1121_v12, %v1120_v11 }
 0x6df   :  { %v1123_v14 = vrot.slane %v1122_v13, 2 }
 0x6e1   :  { %v1124_v8 = vadd.f32 %v1123_v14, %v1122_v13 }
 0x6e3   :  { %v1125_v16 = vrot.slane %v1124_v8, 1 }
 0x6e5   :  { %v1126_v17 = vadd.f32 %v1125_v16, %v1124_v8 }
 0x6e7   :  { %v1127_v18 = vmul.f32 0.0625, %v1126_v17 }
 0x6e9   :  { %v1128_v19 = vsub.f32 %v1118_v7, %v1127_v18  ;;  %v1129_v20 = vsub.f32 %v1119_v9, %v1127_v18 }
 0x6eb   :  { %v1132_v21 = vmul.f32 %v1128_v19, %v1128_v19  ;;  %v1133_v10 = vmul.f32 %v1129_v20, %v1129_v20 }
 0x6ed   :  { %v1134_v22 = vadd.f32 %v1133_v10, %v1132_v21 }
 0x6ef   :  { %v1135_v0 = vrot.slane %v1134_v22, 4 }
 0x6f1   :  { %v1136_v23 = vadd.f32 %v1135_v0, %v1134_v22 }
 0x6f3   :  { %v1137_v24 = vrot.slane %v1136_v23, 2 }
 0x6f5   :  { %v1138_v25 = vadd.f32 %v1137_v24, %v1136_v23 }
 0x6f7   :  { %v1139_v15 = vrot.slane %v1138_v25, 1 }
 0x6f9   :  { %v1140_v27 = vadd.f32 %v1139_v15, %v1138_v25 }
 0x6fb   :  { %v1141_v29 = vmul.f32 0.0625, %v1140_v27 }
 0x6fd   :  { %v1143_v30 = vadd.f32 1e-05, %v1141_v29 }
 0x6ff   :  { %1639 = vrsqrt.f32 %v1143_v30 }
 0x700   :  { %1641 = vrcp.f32 %v1221_v42 }
 0x709   :  { %v1640_v32 = vpop.eup %1639 }
 0x70a   :  { %v1145_v33 = vmul.f32 %v1640_v32, %v1142_v31  ;;  %v1642_v51 = vpop.eup %1641 }
 0x70c   :  { %v1150_v34 = vrot.slane %v1145_v33, %v2317_v55  ;;  %v1628_v55 = vld [vmem:[%s2432_s15 + $0x8] sm:$0xff]   ;;  %s1990_s15 = smov [#allocation23]  }
 0x70d   :  { %s1354_s12 = sshll.u32 %s1990_s15, 4  ;;  %s1355_s12 = int_to_ptr.vmem [resolvable:$true] %s1354_s12 }
 0x70e   :  { %v1153_v36 = vmul.f32 %v1150_v34, %v1129_v20  ;;  %v1152_v37 = vmul.f32 %v1150_v34, %v1128_v19  ;;  %p1938_p7 = scmp.lt.s32.totalorder %s1355_s12, %s1355_s12 }
 0x710   :  { %v1161_v38 = vadd.f32 %v1432_v35, %v1152_v37  ;;  %v1162_v40 = vadd.f32 %v1432_v35, %v1153_v36 }
 0x712   :  { %v1177_v41 = vpack.c.bf16 %v1162_v40, %v1161_v38 }
 0x714   :  { %1505 = vmatpush3.bf16.msra.mxu0 %v1177_v41 }
 0x715   :  { %1510 = vmatprep.subr.bf16.mxu0 %v1988_v2 }
 0x717   :  { %1507 = vmatmul.mubr.msk.bf16.vlgmr.msra.gmra.mrb[12].mxu0 %vm407_vm5, %v1176_v43 }
 0x718   :  { %1511 = vmatpush3.bf16.msra.mxu0 %v1627_v39  ;;  %1526 = vmatprep.mubr.msk.bf16.mxu0 %vm1989_vm1, %v1988_v2 }
 0x719   :  { %1512 = vmatprep.subr.bf16.mxu0 %v1988_v2 }
 0x71c   :  { %1513 = vmatpush3.bf16.msra.mxu0 %v1628_v55 }
 0x71d   :  { %1514 = vmatprep.subr.bf16.mxu0 %v1988_v2 }
 0x720   :  { %1515 = vmatpush3.bf16.msra.mxu0 %v1629_v44 }
 0x721   :  { %1516 = vmatprep.subr.bf16.mxu0 %v1988_v2 }
 0x724   :  { %1517 = vmatpush3.bf16.msra.mxu0 %v1630_v45 }
 0x725   :  { %1518 = vmatprep.subr.bf16.mxu0 %v1988_v2 }
 0x728   :  { %1519 = vmatpush3.bf16.msra.mxu0 %v1631_v46 }
 0x729   :  { %1520 = vmatprep.subr.bf16.mxu0 %v1988_v2 }
 0x72c   :  { %1521 = vmatpush3.bf16.msra.mxu0 %v1632_v47 }
 0x72d   :  { %1522 = vmatprep.subr.bf16.mxu0 %v1988_v2 }
 0x730   :  { %1523 = vmatpush3.bf16.msra.mxu0 %v1633_v48 }
 0x731   :  { %1524 = vmatprep.subr.bf16.mxu0 %v1988_v2  ;;  %v1436_v2 = vld [vmem:[%s2433_s16] ss:$0 sm:$0xff]  ;;  %s1933_s16 = scalar_lea.vmem %s1355_s12, 128 }
 0x732   :  { %p1934_p6 = scmp.ne.s32.totalorder %s1355_s12, %s1933_s16  ;;  %p1939_p8 = scmp.lt.s32.totalorder %s1933_s16, %s1933_s16 }
 0x734   :  { %1525 = vmatpush3.bf16.msra.mxu0 %v1634_v49  ;;  %p1940_p9 = por %p1939_p8, %p1938_p7 }
 0x736   :  { %p1941_p10 = pnand %p1940_p9, %p1934_p6 }
 0x7ea   :  { %v1215_v52 = vpop.f32.mrb[12].mxu0 }
 0x7eb   :  { %v1223_v54 = vmul.f32 %v1642_v51, %v1215_v52  ;;  %v1508_v56 = vpop.f32.mrb[13].mxu0 }
 0x7ec   :  { %v1218_v57 = vpop.f32.mrb[14].mxu0 }
 0x7ed   :  { %v1224_v53 = vpack.c.bf16 %v1223_v54, %v1223_v54  ;;  %v1509_v58 = vpop.f32.mrb[15].mxu0 }
 0x7ef   :  { %1527 = vmatmul.mubr.bf16.vlgmr.msra.gmra.mrb[16].mxu0 %v1224_v53 }
 0x8c2   :  { %v1330_v59 = vpop.f32.mrb[16].mxu0 }
 0x8c3   :  { %v1331_v60 = vadd.f32 %v1436_v2, %v1330_v59  ;;  %v1528_v61 = vpop.f32.mrb[17].mxu0 }
 0x8c4   :  { %v1333_v62 = vpop.f32.mrb[18].mxu0 }
 0x8c5   :  { %v1337_v63 = vsel %vm1336_vm13, %v1331_v60, -1e+30  ;;  %v1529_v1 = vpop.f32.mrb[19].mxu0 }
 0x8c6   :  { %1338 = vmax.xlane.f32.xlu0 %v1337_v63 }
 0x953   :  { %v1339_v3 = vpop.xlane.xlu0 %1338 }
 0x954   :  { %v1340_v5 = vsub.f32 %v1337_v63, %v1339_v3 }
 0x956   :  { %v1341_v26 = vmul.f32 1.442695, %v1340_v5 }
 0x958   :  { %1643 = vpow2.f32 %v1341_v26 }
 0x962   :  { %v1644_v6 = vpop.eup %1643 }
 0x963   :  { %1343 = vadd.xlane.f32.xlu0 %v1644_v6 }
 0x9f0   :  { %v1344_v7 = vpop.xlane.xlu0 %1343 }
 0x9f1   :  { %1645 = vrcp.f32 %v1344_v7 }
 0x9fb   :  { %v1646_v4 = vpop.eup %1645 }
 0x9fc   :  { %v1346_v9 = vmul.f32 %v1646_v4, %v1644_v6 }
 0x9fe   :  { %1347 = vst [vmem:[#allocation23] sm:$0xff] %v1346_v9 }
 0x9ff   :  { %1944 = shalt.err (!%p1941_p10)
}
 0xa00   :  { %s2443_s25 = sld [smem:[#allocation34_spill]] }
 0xa06   :  { %s1945_s11 = scalar_lea.hbm %s2443_s25, 128 }
 0xa07   :  { %p1946_p11 = scmp.ne.s32.totalorder %s2443_s25, %s1945_s11  ;;  %p1949_p12 = scmp.lt.u32.totalorder %s1945_s11, %s2443_s25 }
 0xa09   :  { %p1951_p13 = pnand %p1949_p12, %p1946_p11 }
 0xa0b   :  { %1954 = shalt.err (!%p1951_p13)
}
 0xa0c   :  { %1357 = dma.vmem_to_hbm [thread:$0]  %s1355_s12, 128, %s2443_s25, [#allocation4]  }
 0xa0d   :  { %1969 = dma.done.wait [#allocation4], 128  }
 0xa0e   :  { %1970 = vsyncadd [#allocation4], 4294967168 }
 0xa0f   :  { %1361 = vsyncpa [#allocation3], 1 }
 0xa10   :  { %1362 = vsyncpa [#allocation6], 1 }
 0xa11   :  { %1363 = vsyncpa [#allocation9], 1 }
 0xa12   :  { %1364 = vsyncpa [#allocation12], 1 }
 0xa13   :  { %1365 = vsyncpa [#allocation15], 1 }
 0xa14   :  { %1366 = vsyncpa [#allocation18], 1 }
 0xa15   :  { %1367 = vsyncpa [#allocation21], 1 }
 0xa16   :  { %1368 = vsyncpa [#allocation4], 1 }

</bundles_post_ra>
